<compile_context>
chip_gen: v7x
topology: tpu7x:2x2x1
jax: 0.10.0
libtpu: 0.0.40
codegen_flags: <defaults>
</compile_context>

<pallas_src>
import functools

import jax
import jax.numpy as jnp
from jax import lax
from jax.experimental import pallas as pl
from jax.experimental.pallas import tpu as pltpu

LN_EPS = 1e-5
NEG_INF = -1e30        # finite stand-in for masked_fill(-inf); exp underflows to exactly 0
MAX_SEQ_TILE = 256     # 256-row tiles: ~63-85% of HBM roofline on v6e, VMEM-safe on v7x
VMEM_LIMIT = 48 * 1024 * 1024


def _round_up(n, m):
    return ((n + m - 1) // m) * m


def _seq_tiling(L):
    """Padded length and tile size for a sequence axis (tail-safe, no giant tiles)."""
    if L <= MAX_SEQ_TILE:
        Lp = _round_up(L, 8)
        return Lp, Lp
    Lp = _round_up(L, 128)
    tile = 256 if Lp % 256 == 0 else 128
    return Lp, tile


def _pad_axis(x, axis, target, value=0.0):
    pad = target - x.shape[axis]
    if pad == 0:
        return x
    widths = [(0, 0)] * x.ndim
    widths[axis] = (0, pad)
    return jnp.pad(x, widths, constant_values=value)


def _layer_norm(y, gamma, beta, eps):
    mu = jnp.mean(y, axis=-1, keepdims=True)
    var = jnp.mean(jnp.square(y - mu), axis=-1, keepdims=True)
    return (y - mu) * lax.rsqrt(var + eps) * gamma + beta


# ---------------------------------------------------------------------------
# MultiHeadAttention kernel: QKV projections (K/V cached in VMEM across query tiles),
# masked softmax, single fused output projection, residual + LayerNorm + non_pad_mask.
# ---------------------------------------------------------------------------
def mha_kernel(q_ref, kv_ref, mask_ref, npm_ref,
               wq_ref, bq_ref, wk_ref, bk_ref, wv_ref, bv_ref,
               wo_ref, bo_ref, lng_ref, lnb_ref,
               out_ref, attn_ref,
               k_scr, v_scr, ctx_scr,
               *, num_heads, dim_key, dim_value, eps):
    t = pl.program_id(1)

    # K/V projection hoisted out of the query-tile loop: compute once per batch element
    # (seq-tile axis is "arbitrary", so t iterates sequentially for a fixed b) and keep
    # the bf16 results resident in VMEM scratch.
    @pl.when(t == 0)
    def _():
        xkv = kv_ref[0].astype(jnp.bfloat16)                       # (Lk, D)
        k = jnp.dot(xkv, wk_ref[...], preferred_element_type=jnp.float32) + bk_ref[...]
        v = jnp.dot(xkv, wv_ref[...], preferred_element_type=jnp.float32) + bv_ref[...]
        k_scr[...] = k.astype(k_scr.dtype)
        v_scr[...] = v.astype(v_scr.dtype)

    xq = q_ref[0]                                                  # (TQ, D) f32 residual
    q = jnp.dot(xq.astype(jnp.bfloat16), wq_ref[...],
                preferred_element_type=jnp.float32) + bq_ref[...]
    q = q.astype(jnp.bfloat16)                                     # (TQ, H*dk)

    m = mask_ref[0]                                                # (TQ, Lk) bf16, 1 == masked
    scale = 1.0 / (float(dim_key) ** 0.5)

    # Per-head attention.  Scores/probs stay f32; MXU operands are bf16.
    # TODO(synk): for very long Lk (and when attn probs are not consumed) switch to a
    # flash-style Lk-tiled online softmax / lax.fori_loop over heads to bound VMEM.
    for h in range(num_heads):
        qh = q[:, h * dim_key:(h + 1) * dim_key]                   # (TQ, dk) bf16
        kh = k_scr[:, h * dim_key:(h + 1) * dim_key]               # (Lk, dk) bf16
        vh = v_scr[:, h * dim_value:(h + 1) * dim_value]           # (Lk, dv) bf16
        # q @ k^T without an explicit transpose.
        s = lax.dot_general(qh, kh, (((1,), (1,)), ((), ())),
                            preferred_element_type=jnp.float32) * scale
        s = jnp.where(m > 0, NEG_INF, s)
        s = s - jnp.max(s, axis=-1, keepdims=True)
        e = jnp.exp(s)
        inv_l = pl.reciprocal(jnp.sum(e, axis=-1, keepdims=True), approx=True)
        a = e * inv_l                                              # (TQ, Lk) f32
        attn_ref[h, 0] = a.astype(attn_ref.dtype)                  # bf16 HBM write
        ctx = jnp.dot(a.astype(jnp.bfloat16), vh, preferred_element_type=jnp.float32)
        ctx_scr[:, h * dim_value:(h + 1) * dim_value] = ctx.astype(ctx_scr.dtype)

    # Single fused output projection over K = H*dv (full-depth MXU contraction).
    o = jnp.dot(ctx_scr[...], wo_ref[...],
                preferred_element_type=jnp.float32) + bo_ref[...]
    # dropout(output_linear(.)) and attention dropout are identity at inference.
    y = _layer_norm(o + xq, lng_ref[...], lnb_ref[...], eps)
    out_ref[0] = (y * npm_ref[0]).astype(out_ref.dtype)


def multi_head_attention(q_in, kv_in, attn_mask, non_pad_mask, p,
                         *, num_heads, dim_key, dim_value):
    B, Lq, D = q_in.shape
    Lk = kv_in.shape[1]
    H, dk, dv = num_heads, dim_key, dim_value

    Lq_p, q_tile = _seq_tiling(Lq)
    Lk_p = _round_up(Lk, 128)          # lane-aligned key axis -> unmasked attn stores
    n_qt = Lq_p // q_tile

    q_pad = _pad_axis(q_in, 1, Lq_p)
    kv_pad = _pad_axis(kv_in, 1, Lk_p)
    mask_pad = _pad_axis(_pad_axis(attn_mask.astype(jnp.bfloat16), 2, Lk_p, 1.0),
                         1, Lq_p, 1.0)                    # padded keys/queries masked
    npm_pad = _pad_axis(non_pad_mask.astype(jnp.bfloat16), 1, Lq_p)

    kernel = functools.partial(mha_kernel, num_heads=H, dim_key=dk,
                               dim_value=dv, eps=LN_EPS)

    def wspec(shape):      # weights: resident block, constant index_map
        return pl.BlockSpec(shape, lambda b, t: (0, 0))

    out_p, attn_p = pl.pallas_call(
        kernel,
        out_shape=(
            jax.ShapeDtypeStruct((B, Lq_p, D), q_in.dtype),
            jax.ShapeDtypeStruct((H, B, Lq_p, Lk_p), jnp.bfloat16),
        ),
        grid_spec=pltpu.PrefetchScalarGridSpec(
            num_scalar_prefetch=0,
            grid=(B, n_qt),
            in_specs=[
                pl.BlockSpec((1, q_tile, D), lambda b, t: (b, t, 0)),    # query tile
                pl.BlockSpec((1, Lk_p, D), lambda b, t: (b, 0, 0)),      # full K/V source
                pl.BlockSpec((1, q_tile, Lk_p), lambda b, t: (b, t, 0)),  # attn mask (bf16)
                pl.BlockSpec((1, q_tile, 1), lambda b, t: (b, t, 0)),    # non-pad mask
                wspec((D, H * dk)), wspec((1, H * dk)),                  # Wq, bq
                wspec((D, H * dk)), wspec((1, H * dk)),                  # Wk, bk
                wspec((D, H * dv)), wspec((1, H * dv)),                  # Wv, bv
                wspec((H * dv, D)), wspec((1, D)),                       # Wo, bo
                wspec((1, D)), wspec((1, D)),                            # LN gamma, beta
            ],
            out_specs=[
                pl.BlockSpec((1, q_tile, D), lambda b, t: (b, t, 0)),
                pl.BlockSpec((H, 1, q_tile, Lk_p), lambda b, t: (0, b, t, 0)),
            ],
            scratch_shapes=[
                pltpu.VMEM((Lk_p, H * dk), jnp.bfloat16),    # projected K (resident over t)
                pltpu.VMEM((Lk_p, H * dv), jnp.bfloat16),    # projected V
                pltpu.VMEM((q_tile, H * dv), jnp.bfloat16),  # per-head contexts
            ]),
        compiler_params=pltpu.CompilerParams(
            dimension_semantics=("parallel", "arbitrary"),
            vmem_limit_bytes=VMEM_LIMIT),
    )(q_pad, kv_pad, mask_pad, npm_pad,
      p["wq"], p["bq"], p["wk"], p["bk"], p["wv"], p["bv"],
      p["wo"], p["bo"], p["ln_g"], p["ln_b"])

    out = out_p[:, :Lq] if Lq_p != Lq else out_p
    # PyTorch returns attn as (num_heads*batch, Lq, Lk) with head-major ordering.
    attn = attn_p[:, :, :Lq, :Lk].reshape(H * B, Lq, Lk)
    return out, attn


# ---------------------------------------------------------------------------
# PositionwiseFeedForwardWithConv kernel: two kernel-size-1 convs (== matmuls in (L, D)
# layout) + ReLU + residual + LayerNorm + non_pad_mask, fully fused. No transposes.
# ---------------------------------------------------------------------------
def ffn_kernel(x_ref, npm_ref, w1_ref, b1_ref, w2_ref, b2_ref, lng_ref, lnb_ref,
               out_ref, *, eps):
    x = x_ref[0]                                                   # (TL, D) f32
    h = jnp.dot(x.astype(jnp.bfloat16), w1_ref[...],
                preferred_element_type=jnp.float32) + b1_ref[...]
    h = jnp.maximum(h, 0.0)                                        # ReLU (f32)
    y = jnp.dot(h.astype(jnp.bfloat16), w2_ref[...],
                preferred_element_type=jnp.float32) + b2_ref[...]
    # dropout is identity at inference.
    # TODO(synk): tile the Dh axis as a reduction grid axis for dim_inner >= 4096 on v7x.
    y = _layer_norm(y + x, lng_ref[...], lnb_ref[...], eps)
    out_ref[0] = (y * npm_ref[0]).astype(out_ref.dtype)


def positionwise_ffn(x, non_pad_mask, p):
    B, L, D = x.shape
    Dh = p["w1"].shape[1]
    Lp, l_tile = _seq_tiling(L)
    n_lt = Lp // l_tile

    x_pad = _pad_axis(x, 1, Lp)
    npm_pad = _pad_axis(non_pad_mask.astype(jnp.bfloat16), 1, Lp)

    kernel = functools.partial(ffn_kernel, eps=LN_EPS)

    def wspec(shape):
        return pl.BlockSpec(shape, lambda b, t: (0, 0))

    out_p = pl.pallas_call(
        kernel,
        out_shape=jax.ShapeDtypeStruct((B, Lp, D), x.dtype),
        grid_spec=pltpu.PrefetchScalarGridSpec(
            num_scalar_prefetch=0,
            grid=(B, n_lt),
            in_specs=[
                pl.BlockSpec((1, l_tile, D), lambda b, t: (b, t, 0)),
                pl.BlockSpec((1, l_tile, 1), lambda b, t: (b, t, 0)),
                wspec((D, Dh)), wspec((1, Dh)),      # conv_1 (k=1) as (D, Dh) matmul
                wspec((Dh, D)), wspec((1, D)),       # conv_2 (k=1) as (Dh, D) matmul
                wspec((1, D)), wspec((1, D)),        # LN gamma, beta
            ],
            out_specs=pl.BlockSpec((1, l_tile, D), lambda b, t: (b, t, 0)),
        ),
        compiler_params=pltpu.CompilerParams(
            dimension_semantics=("parallel", "parallel"),
            vmem_limit_bytes=VMEM_LIMIT),
    )(x_pad, npm_pad, p["w1"], p["b1"], p["w2"], p["b2"], p["ln_g"], p["ln_b"])

    return out_p[:, :L] if Lp != L else out_p


# ---------------------------------------------------------------------------
# DecoderLayer forward
# ---------------------------------------------------------------------------
def decoder_layer_forward(decoder_input, encoder_output, non_pad_mask,
                          self_attn_mask, dec_enc_attn_mask, params,
                          *, num_heads, dim_key, dim_value):
    y, self_attn = multi_head_attention(
        decoder_input, decoder_input, self_attn_mask, non_pad_mask,
        params["self_attn"], num_heads=num_heads, dim_key=dim_key, dim_value=dim_value)
    y, enc_attn = multi_head_attention(
        y, encoder_output, dec_enc_attn_mask, non_pad_mask,
        params["enc_attn"], num_heads=num_heads, dim_key=dim_key, dim_value=dim_value)
    y = positionwise_ffn(y, non_pad_mask, params["ffn"])
    return y, self_attn, enc_attn


# ---------------------------------------------------------------------------
# Parameters.  Matmul weights stored in bf16 (MXU-native, half the DMA/VMEM);
# biases and LayerNorm params stay f32 (added to f32 accumulations).
# ---------------------------------------------------------------------------
def init_params(key, dim_model, dim_inner, num_heads, dim_key, dim_value):
    D, Dh, H, dk, dv = dim_model, dim_inner, num_heads, dim_key, dim_value

    def linear(k, fan_in, fan_out, std):
        kw, kb = jax.random.split(k)
        w = (jax.random.normal(kw, (fan_in, fan_out), jnp.float32) * std).astype(jnp.bfloat16)
        b = jax.random.uniform(kb, (1, fan_out), jnp.float32, -0.1, 0.1)
        return w, b

    def mha_params(k):
        k1, k2, k3, k4, k5 = jax.random.split(k, 5)
        wq, bq = linear(k1, D, H * dk, (2.0 / (D + dk)) ** 0.5)
        wk, bk = linear(k2, D, H * dk, (2.0 / (D + dk)) ** 0.5)
        wv, bv = linear(k3, D, H * dv, (2.0 / (D + dv)) ** 0.5)
        wo, bo = linear(k4, H * dv, D, (2.0 / (H * dv + D)) ** 0.5)
        g = 1.0 + 0.1 * jax.random.normal(k5, (1, D), jnp.float32)
        b = 0.05 * jnp.ones((1, D), jnp.float32)
        return dict(wq=wq, bq=bq, wk=wk, bk=bk, wv=wv, bv=bv,
                    wo=wo, bo=bo, ln_g=g, ln_b=b)

    def ffn_params(k):
        k1, k2, k3 = jax.random.split(k, 3)
        w1, b1 = linear(k1, D, Dh, (2.0 / (D + Dh)) ** 0.5)
        w2, b2 = linear(k2, Dh, D, (2.0 / (D + Dh)) ** 0.5)
        g = 1.0 + 0.1 * jax.random.normal(k3, (1, D), jnp.float32)
        b = jnp.zeros((1, D), jnp.float32)
        return dict(w1=w1, b1=b1, w2=w2, b2=b2, ln_g=g, ln_b=b)

    k1, k2, k3 = jax.random.split(key, 3)
    return dict(self_attn=mha_params(k1), enc_attn=mha_params(k2), ffn=ffn_params(k3))


# ---------------------------------------------------------------------------
# Pure-JAX reference (mirrors the PyTorch math and the kernel's bf16 operand casts).
# ---------------------------------------------------------------------------
def _mha_ref(q_in, kv_in, mask, npm, p, H, dk, dv):
    f32, bf = jnp.float32, jnp.bfloat16
    B, Lq, _ = q_in.shape
    Lk = kv_in.shape[1]
    q = jnp.einsum('bld,de->ble', q_in.astype(bf), p["wq"],
                   preferred_element_type=f32) + p["bq"]
    k = jnp.einsum('bld,de->ble', kv_in.astype(bf), p["wk"],
                   preferred_element_type=f32) + p["bk"]
    v = jnp.einsum('bld,de->ble', kv_in.astype(bf), p["wv"],
                   preferred_element_type=f32) + p["bv"]
    q = jnp.transpose(q.astype(bf).reshape(B, Lq, H, dk), (2, 0, 1, 3))
    k = jnp.transpose(k.astype(bf).reshape(B, Lk, H, dk), (2, 0, 1, 3))
    v = jnp.transpose(v.astype(bf).reshape(B, Lk, H, dv), (2, 0, 1, 3))
    s = jnp.einsum('hbqd,hbkd->hbqk', q, k, preferred_element_type=f32) / (dk ** 0.5)
    s = jnp.where(mask[None] > 0.0, NEG_INF, s)
    a = jax.nn.softmax(s, axis=-1)
    ctx = jnp.einsum('hbqk,hbkd->hbqd', a.astype(bf), v, preferred_element_type=f32)
    ctx = jnp.transpose(ctx.astype(bf), (1, 2, 0, 3)).reshape(B, Lq, H * dv)
    o = jnp.einsum('ble,ed->bld', ctx, p["wo"], preferred_element_type=f32) + p["bo"]
    y = _layer_norm(o + q_in, p["ln_g"], p["ln_b"], LN_EPS) * npm
    return y, a.reshape(H * B, Lq, Lk)


def _ffn_ref(x, npm, p):
    f32, bf = jnp.float32, jnp.bfloat16
    h = jnp.einsum('bld,de->ble', x.astype(bf), p["w1"],
                   preferred_element_type=f32) + p["b1"]
    h = jnp.maximum(h, 0.0)
    y = jnp.einsum('ble,ed->bld', h.astype(bf), p["w2"],
                   preferred_element_type=f32) + p["b2"]
    return _layer_norm(y + x, p["ln_g"], p["ln_b"], LN_EPS) * npm


def _decoder_layer_ref(dec_in, enc_out, npm, self_mask, de_mask, params, H, dk, dv):
    y, sa = _mha_ref(dec_in, dec_in, self_mask, npm, params["self_attn"], H, dk, dv)
    y, ea = _mha_ref(y, enc_out, de_mask, npm, params["enc_attn"], H, dk, dv)
    y = _ffn_ref(y, npm, params["ffn"])
    return y, sa, ea


if __name__ == "__main__":
    B, L_dec, L_enc = 2, 8, 16
    dim_model, dim_inner = 32, 64
    num_heads, dim_key, dim_value = 4, 8, 8

    key = jax.random.PRNGKey(0)
    k_dec, k_enc, k_par = jax.random.split(key, 3)
    decoder_input = jax.random.normal(k_dec, (B, L_dec, dim_model), jnp.float32)
    encoder_output = jax.random.normal(k_enc, (B, L_enc, dim_model), jnp.float32)

    # Masks (1.0 == masked), matching the usual transformer mask helpers.
    dec_lens = jnp.array([L_dec, L_dec - 2])
    enc_lens = jnp.array([L_enc, L_enc - 3])
    dpos = jnp.arange(L_dec)
    epos = jnp.arange(L_enc)
    non_pad_mask = (dpos[None, :] < dec_lens[:, None]).astype(jnp.float32)[..., None]
    subsequent = dpos[None, :] > dpos[:, None]
    dec_key_pad = dpos[None, :] >= dec_lens[:, None]
    self_attn_mask = (subsequent[None] | dec_key_pad[:, None, :]).astype(jnp.float32)
    enc_key_pad = epos[None, :] >= enc_lens[:, None]
    dec_enc_attn_mask = jnp.broadcast_to(
        enc_key_pad[:, None, :], (B, L_dec, L_enc)).astype(jnp.float32)

    params = init_params(k_par, dim_model, dim_inner, num_heads, dim_key, dim_value)

    fwd = jax.jit(functools.partial(decoder_layer_forward, num_heads=num_heads,
                                    dim_key=dim_key, dim_value=dim_value))
    out, self_attn, enc_attn = fwd(decoder_input, encoder_output, non_pad_mask,
                                   self_attn_mask, dec_enc_attn_mask, params)
    out, self_attn, enc_attn = jax.block_until_ready((out, self_attn, enc_attn))

    assert out.shape == (B, L_dec, dim_model), out.shape
    assert self_attn.shape == (num_heads * B, L_dec, L_dec), self_attn.shape
    assert enc_attn.shape == (num_heads * B, L_dec, L_enc), enc_attn.shape

    ref_out, ref_sa, ref_ea = _decoder_layer_ref(
        decoder_input, encoder_output, non_pad_mask, self_attn_mask,
        dec_enc_attn_mask, params, num_heads, dim_key, dim_value)

    assert jnp.allclose(out, ref_out, atol=3e-2, rtol=3e-2), \
        float(jnp.max(jnp.abs(out - ref_out)))
    assert jnp.allclose(self_attn.astype(jnp.float32), ref_sa, atol=3e-2, rtol=3e-2)
    assert jnp.allclose(enc_attn.astype(jnp.float32), ref_ea, atol=3e-2, rtol=3e-2)
    print("KERNEL_OK")
</pallas_src>

<mosaic_0001>
module attributes {stable_mosaic.version = 11 : i64} {
  func.func @mha_kernel(%arg0: i32, %arg1: i32, %arg2: memref<1x8x32xf32, #tpu.memory_space<vmem>>, %arg3: memref<1x128x32xf32, #tpu.memory_space<vmem>>, %arg4: memref<1x8x128xbf16, #tpu.memory_space<vmem>>, %arg5: memref<1x8x1xbf16, #tpu.memory_space<vmem>>, %arg6: memref<32x32xbf16, #tpu.memory_space<vmem>>, %arg7: memref<1x32xf32, #tpu.memory_space<vmem>>, %arg8: memref<32x32xbf16, #tpu.memory_space<vmem>>, %arg9: memref<1x32xf32, #tpu.memory_space<vmem>>, %arg10: memref<32x32xbf16, #tpu.memory_space<vmem>>, %arg11: memref<1x32xf32, #tpu.memory_space<vmem>>, %arg12: memref<32x32xbf16, #tpu.memory_space<vmem>>, %arg13: memref<1x32xf32, #tpu.memory_space<vmem>>, %arg14: memref<1x32xf32, #tpu.memory_space<vmem>>, %arg15: memref<1x32xf32, #tpu.memory_space<vmem>>, %arg16: memref<1x8x32xf32, #tpu.memory_space<vmem>>, %arg17: memref<4x1x8x128xbf16, #tpu.memory_space<vmem>>, %arg18: memref<128x32xbf16, #tpu.memory_space<vmem>>, %arg19: memref<128x32xbf16, #tpu.memory_space<vmem>>, %arg20: memref<8x32xbf16, #tpu.memory_space<vmem>>) attributes {dimension_semantics = [#tpu.dimension_semantics<parallel>, #tpu.dimension_semantics<arbitrary>], iteration_bounds = array<i64: 2, 1>, scalar_prefetch = 0 : i64, scratch_operands = 3 : i64, tpu.core_type = #tpu.core_type<tc>, window_params = [{transform_indices = @transform_0, window_bounds = array<i64: 1, 8, 32>}, {transform_indices = @transform_1, window_bounds = array<i64: 1, 128, 32>}, {transform_indices = @transform_2, window_bounds = array<i64: 1, 8, 128>}, {transform_indices = @transform_3, window_bounds = array<i64: 1, 8, 1>}, {pipeline_mode = #tpu.pipeline_mode<synchronous>, transform_indices = @transform_4, window_bounds = array<i64: 32, 32>}, {pipeline_mode = #tpu.pipeline_mode<synchronous>, transform_indices = @transform_5, window_bounds = array<i64: 1, 32>}, {pipeline_mode = #tpu.pipeline_mode<synchronous>, transform_indices = @transform_6, window_bounds = array<i64: 32, 32>}, {pipeline_mode = #tpu.pipeline_mode<synchronous>, transform_indices = @transform_7, window_bounds = array<i64: 1, 32>}, {pipeline_mode = #tpu.pipeline_mode<synchronous>, transform_indices = @transform_8, window_bounds = array<i64: 32, 32>}, {pipeline_mode = #tpu.pipeline_mode<synchronous>, transform_indices = @transform_9, window_bounds = array<i64: 1, 32>}, {pipeline_mode = #tpu.pipeline_mode<synchronous>, transform_indices = @transform_10, window_bounds = array<i64: 32, 32>}, {pipeline_mode = #tpu.pipeline_mode<synchronous>, transform_indices = @transform_11, window_bounds = array<i64: 1, 32>}, {pipeline_mode = #tpu.pipeline_mode<synchronous>, transform_indices = @transform_12, window_bounds = array<i64: 1, 32>}, {pipeline_mode = #tpu.pipeline_mode<synchronous>, transform_indices = @transform_13, window_bounds = array<i64: 1, 32>}, {transform_indices = @transform_14, window_bounds = array<i64: 1, 8, 32>}, {transform_indices = @transform_15, window_bounds = array<i64: 4, 1, 8, 128>}]} {
    %c0_i32 = arith.constant 0 : i32
    %0 = arith.cmpi eq, %arg1, %c0_i32 : i32
    %1 = arith.extui %0 : i1 to i32
    %c0_i32_0 = arith.constant 0 : i32
    %2 = arith.cmpi ne, %1, %c0_i32_0 : i32
    scf.if %2 {
      %c0_94 = arith.constant 0 : index
      %c0_95 = arith.constant 0 : index
      %c0_96 = arith.constant 0 : index
      %165 = vector.load %arg3[%c0_94, %c0_95, %c0_96] : memref<1x128x32xf32, #tpu.memory_space<vmem>>, vector<1x128x32xf32>
      %166 = vector.shape_cast %165 : vector<1x128x32xf32> to vector<128x32xf32>
      %167 = arith.truncf %166 : vector<128x32xf32> to vector<128x32xbf16>
      %c0_97 = arith.constant 0 : index
      %c0_98 = arith.constant 0 : index
      %168 = vector.load %arg8[%c0_97, %c0_98] : memref<32x32xbf16, #tpu.memory_space<vmem>>, vector<32x32xbf16>
      %cst_99 = arith.constant dense<0.000000e+00> : vector<128x32xf32>
      %169 = tpu.matmul %167, %168, %cst_99 {dimension_numbers = #tpu.dot_dimension_numbers<[1], [0], [0], [1], [0, 0, 1, 1], [], []>} : vector<128x32xbf16>, vector<32x32xbf16>, vector<128x32xf32> -> vector<128x32xf32>
      %c0_100 = arith.constant 0 : index
      %c0_101 = arith.constant 0 : index
      %170 = vector.load %arg9[%c0_100, %c0_101] : memref<1x32xf32, #tpu.memory_space<vmem>>, vector<1x32xf32>
      %171 = vector.broadcast %170 : vector<1x32xf32> to vector<128x32xf32>
      %172 = arith.addf %169, %171 : vector<128x32xf32>
      %c0_102 = arith.constant 0 : index
      %c0_103 = arith.constant 0 : index
      %173 = vector.load %arg10[%c0_102, %c0_103] : memref<32x32xbf16, #tpu.memory_space<vmem>>, vector<32x32xbf16>
      %cst_104 = arith.constant dense<0.000000e+00> : vector<128x32xf32>
      %174 = tpu.matmul %167, %173, %cst_104 {dimension_numbers = #tpu.dot_dimension_numbers<[1], [0], [0], [1], [0, 0, 1, 1], [], []>} : vector<128x32xbf16>, vector<32x32xbf16>, vector<128x32xf32> -> vector<128x32xf32>
      %c0_105 = arith.constant 0 : index
      %c0_106 = arith.constant 0 : index
      %175 = vector.load %arg11[%c0_105, %c0_106] : memref<1x32xf32, #tpu.memory_space<vmem>>, vector<1x32xf32>
      %176 = vector.broadcast %175 : vector<1x32xf32> to vector<128x32xf32>
      %177 = arith.addf %174, %176 : vector<128x32xf32>
      %178 = arith.truncf %172 : vector<128x32xf32> to vector<128x32xbf16>
      %c0_107 = arith.constant 0 : index
      %c0_108 = arith.constant 0 : index
      %179 = vector.load %arg18[%c0_107, %c0_108] : memref<128x32xbf16, #tpu.memory_space<vmem>>, vector<128x32xbf16>
      tpu.vector_store %arg18[%c0_107, %c0_108], %178 {strides = array<i32>} : memref<128x32xbf16, #tpu.memory_space<vmem>>, vector<128x32xbf16>,
      %180 = arith.truncf %177 : vector<128x32xf32> to vector<128x32xbf16>
      %c0_109 = arith.constant 0 : index
      %c0_110 = arith.constant 0 : index
      %181 = vector.load %arg19[%c0_109, %c0_110] : memref<128x32xbf16, #tpu.memory_space<vmem>>, vector<128x32xbf16>
      tpu.vector_store %arg19[%c0_109, %c0_110], %180 {strides = array<i32>} : memref<128x32xbf16, #tpu.memory_space<vmem>>, vector<128x32xbf16>,
    } else {
    }
    %c0 = arith.constant 0 : index
    %c0_1 = arith.constant 0 : index
    %c0_2 = arith.constant 0 : index
    %3 = vector.load %arg2[%c0, %c0_1, %c0_2] : memref<1x8x32xf32, #tpu.memory_space<vmem>>, vector<1x8x32xf32>
    %4 = vector.shape_cast %3 : vector<1x8x32xf32> to vector<8x32xf32>
    %5 = arith.truncf %4 : vector<8x32xf32> to vector<8x32xbf16>
    %c0_3 = arith.constant 0 : index
    %c0_4 = arith.constant 0 : index
    %6 = vector.load %arg6[%c0_3, %c0_4] : memref<32x32xbf16, #tpu.memory_space<vmem>>, vector<32x32xbf16>
    %cst = arith.constant dense<0.000000e+00> : vector<8x32xf32>
    %7 = tpu.matmul %5, %6, %cst {dimension_numbers = #tpu.dot_dimension_numbers<[1], [0], [0], [1], [0, 0, 1, 1], [], []>} : vector<8x32xbf16>, vector<32x32xbf16>, vector<8x32xf32> -> vector<8x32xf32>
    %c0_5 = arith.constant 0 : index
    %c0_6 = arith.constant 0 : index
    %8 = vector.load %arg7[%c0_5, %c0_6] : memref<1x32xf32, #tpu.memory_space<vmem>>, vector<1x32xf32>
    %9 = vector.broadcast %8 : vector<1x32xf32> to vector<8x32xf32>
    %10 = arith.addf %7, %9 : vector<8x32xf32>
    %11 = arith.truncf %10 : vector<8x32xf32> to vector<8x32xbf16>
    %c0_7 = arith.constant 0 : index
    %c0_8 = arith.constant 0 : index
    %c0_9 = arith.constant 0 : index
    %12 = vector.load %arg4[%c0_7, %c0_8, %c0_9] : memref<1x8x128xbf16, #tpu.memory_space<vmem>>, vector<1x8x128xbf16>
    %13 = vector.shape_cast %12 : vector<1x8x128xbf16> to vector<8x128xbf16>
    %14 = vector.extract_strided_slice %11 {offsets = [0, 0], sizes = [8, 8], strides = [1, 1]} : vector<8x32xbf16> to vector<8x8xbf16>
    %c0_10 = arith.constant 0 : index
    %c0_11 = arith.constant 0 : index
    %15 = vector.load %arg18[%c0_10, %c0_11] : memref<128x32xbf16, #tpu.memory_space<vmem>>, vector<128x8xbf16>
    %c0_12 = arith.constant 0 : index
    %c0_13 = arith.constant 0 : index
    %16 = vector.load %arg19[%c0_12, %c0_13] : memref<128x32xbf16, #tpu.memory_space<vmem>>, vector<128x8xbf16>
    %cst_14 = arith.constant dense<0.000000e+00> : vector<8x128xf32>
    %17 = tpu.matmul %14, %15, %cst_14 {dimension_numbers = #tpu.dot_dimension_numbers<[1], [1], [0], [0], [0, 0, 1, 0], [], []>} : vector<8x8xbf16>, vector<128x8xbf16>, vector<8x128xf32> -> vector<8x128xf32>
    %cst_15 = arith.constant 0.353553385 : f32
    %18 = vector.broadcast %cst_15 : f32 to vector<8x128xf32>
    %19 = arith.mulf %17, %18 : vector<8x128xf32>
    %cst_16 = arith.constant 0.000000e+00 : bf16
    %20 = vector.broadcast %cst_16 : bf16 to vector<8x128xbf16>
    %21 = arith.cmpf ogt, %13, %20 : vector<8x128xbf16>
    %cst_17 = arith.constant -1.000000e+30 : f32
    %22 = vector.broadcast %cst_17 : f32 to vector<8x128xf32>
    %23 = arith.select %21, %22, %19 : vector<8x128xi1>, vector<8x128xf32>
    %cst_18 = arith.constant dense<0xFF800000> : vector<8xf32>
    %24 = vector.multi_reduction <maximumf>, %23, %cst_18 [1] : vector<8x128xf32> to vector<8xf32>
    %25 = vector.shape_cast %24 : vector<8xf32> to vector<8x1xf32>
    %26 = vector.broadcast %25 : vector<8x1xf32> to vector<8x128xf32>
    %27 = arith.subf %23, %26 : vector<8x128xf32>
    %28 = math.exp %27 : vector<8x128xf32>
    %cst_19 = arith.constant dense<0.000000e+00> : vector<8xf32>
    %29 = vector.multi_reduction <add>, %28, %cst_19 [1] : vector<8x128xf32> to vector<8xf32>
    %30 = vector.shape_cast %29 : vector<8xf32> to vector<8x1xf32>
    %31 = tpu.reciprocal %30 {approx = true} : vector<8x1xf32> -> vector<8x1xf32>
    %32 = vector.broadcast %31 : vector<8x1xf32> to vector<8x128xf32>
    %33 = arith.mulf %28, %32 : vector<8x128xf32>
    %34 = arith.truncf %33 : vector<8x128xf32> to vector<8x128xbf16>
    %c0_20 = arith.constant 0 : index
    %c0_21 = arith.constant 0 : index
    %c0_22 = arith.constant 0 : index
    %c0_23 = arith.constant 0 : index
    %35 = vector.load %arg17[%c0_20, %c0_21, %c0_22, %c0_23] : memref<4x1x8x128xbf16, #tpu.memory_space<vmem>>, vector<1x1x8x128xbf16>
    %36 = vector.shape_cast %35 : vector<1x1x8x128xbf16> to vector<8x128xbf16>
    %37 = vector.shape_cast %34 : vector<8x128xbf16> to vector<1x1x8x128xbf16>
    tpu.vector_store %arg17[%c0_20, %c0_21, %c0_22, %c0_23], %37 {strides = array<i32>} : memref<4x1x8x128xbf16, #tpu.memory_space<vmem>>, vector<1x1x8x128xbf16>,
    %38 = arith.truncf %33 : vector<8x128xf32> to vector<8x128xbf16>
    %cst_24 = arith.constant dense<0.000000e+00> : vector<8x8xf32>
    %39 = tpu.matmul %38, %16, %cst_24 {dimension_numbers = #tpu.dot_dimension_numbers<[1], [0], [0], [1], [0, 0, 1, 1], [], []>} : vector<8x128xbf16>, vector<128x8xbf16>, vector<8x8xf32> -> vector<8x8xf32>
    %40 = arith.truncf %39 : vector<8x8xf32> to vector<8x8xbf16>
    %c0_25 = arith.constant 0 : index
    %c0_26 = arith.constant 0 : index
    %41 = vector.load %arg20[%c0_25, %c0_26] : memref<8x32xbf16, #tpu.memory_space<vmem>>, vector<8x8xbf16>
    tpu.vector_store %arg20[%c0_25, %c0_26], %40 {strides = array<i32>} : memref<8x32xbf16, #tpu.memory_space<vmem>>, vector<8x8xbf16>,
    %42 = vector.extract_strided_slice %11 {offsets = [0, 8], sizes = [8, 8], strides = [1, 1]} : vector<8x32xbf16> to vector<8x8xbf16>
    %c0_27 = arith.constant 0 : index
    %c8 = arith.constant 8 : index
    %43 = vector.load %arg18[%c0_27, %c8] : memref<128x32xbf16, #tpu.memory_space<vmem>>, vector<128x8xbf16>
    %c0_28 = arith.constant 0 : index
    %c8_29 = arith.constant 8 : index
    %44 = vector.load %arg19[%c0_28, %c8_29] : memref<128x32xbf16, #tpu.memory_space<vmem>>, vector<128x8xbf16>
    %cst_30 = arith.constant dense<0.000000e+00> : vector<8x128xf32>
    %45 = tpu.matmul %42, %43, %cst_30 {dimension_numbers = #tpu.dot_dimension_numbers<[1], [1], [0], [0], [0, 0, 1, 0], [], []>} : vector<8x8xbf16>, vector<128x8xbf16>, vector<8x128xf32> -> vector<8x128xf32>
    %cst_31 = arith.constant 0.353553385 : f32
    %46 = vector.broadcast %cst_31 : f32 to vector<8x128xf32>
    %47 = arith.mulf %45, %46 : vector<8x128xf32>
    %cst_32 = arith.constant 0.000000e+00 : bf16
    %48 = vector.broadcast %cst_32 : bf16 to vector<8x128xbf16>
    %49 = arith.cmpf ogt, %13, %48 : vector<8x128xbf16>
    %cst_33 = arith.constant -1.000000e+30 : f32
    %50 = vector.broadcast %cst_33 : f32 to vector<8x128xf32>
    %51 = arith.select %49, %50, %47 : vector<8x128xi1>, vector<8x128xf32>
    %cst_34 = arith.constant dense<0xFF800000> : vector<8xf32>
    %52 = vector.multi_reduction <maximumf>, %51, %cst_34 [1] : vector<8x128xf32> to vector<8xf32>
    %53 = vector.shape_cast %52 : vector<8xf32> to vector<8x1xf32>
    %54 = vector.broadcast %53 : vector<8x1xf32> to vector<8x128xf32>
    %55 = arith.subf %51, %54 : vector<8x128xf32>
    %56 = math.exp %55 : vector<8x128xf32>
    %cst_35 = arith.constant dense<0.000000e+00> : vector<8xf32>
    %57 = vector.multi_reduction <add>, %56, %cst_35 [1] : vector<8x128xf32> to vector<8xf32>
    %58 = vector.shape_cast %57 : vector<8xf32> to vector<8x1xf32>
    %59 = tpu.reciprocal %58 {approx = true} : vector<8x1xf32> -> vector<8x1xf32>
    %60 = vector.broadcast %59 : vector<8x1xf32> to vector<8x128xf32>
    %61 = arith.mulf %56, %60 : vector<8x128xf32>
    %62 = arith.truncf %61 : vector<8x128xf32> to vector<8x128xbf16>
    %c1 = arith.constant 1 : index
    %c0_36 = arith.constant 0 : index
    %c0_37 = arith.constant 0 : index
    %c0_38 = arith.constant 0 : index
    %63 = vector.load %arg17[%c1, %c0_36, %c0_37, %c0_38] : memref<4x1x8x128xbf16, #tpu.memory_space<vmem>>, vector<1x1x8x128xbf16>
    %64 = vector.shape_cast %63 : vector<1x1x8x128xbf16> to vector<8x128xbf16>
    %65 = vector.shape_cast %62 : vector<8x128xbf16> to vector<1x1x8x128xbf16>
    tpu.vector_store %arg17[%c1, %c0_36, %c0_37, %c0_38], %65 {strides = array<i32>} : memref<4x1x8x128xbf16, #tpu.memory_space<vmem>>, vector<1x1x8x128xbf16>,
    %66 = arith.truncf %61 : vector<8x128xf32> to vector<8x128xbf16>
    %cst_39 = arith.constant dense<0.000000e+00> : vector<8x8xf32>
    %67 = tpu.matmul %66, %44, %cst_39 {dimension_numbers = #tpu.dot_dimension_numbers<[1], [0], [0], [1], [0, 0, 1, 1], [], []>} : vector<8x128xbf16>, vector<128x8xbf16>, vector<8x8xf32> -> vector<8x8xf32>
    %68 = arith.truncf %67 : vector<8x8xf32> to vector<8x8xbf16>
    %c0_40 = arith.constant 0 : index
    %c8_41 = arith.constant 8 : index
    %69 = vector.load %arg20[%c0_40, %c8_41] : memref<8x32xbf16, #tpu.memory_space<vmem>>, vector<8x8xbf16>
    tpu.vector_store %arg20[%c0_40, %c8_41], %68 {strides = array<i32>} : memref<8x32xbf16, #tpu.memory_space<vmem>>, vector<8x8xbf16>,
    %70 = vector.extract_strided_slice %11 {offsets = [0, 16], sizes = [8, 8], strides = [1, 1]} : vector<8x32xbf16> to vector<8x8xbf16>
    %c0_42 = arith.constant 0 : index
    %c16 = arith.constant 16 : index
    %71 = vector.load %arg18[%c0_42, %c16] : memref<128x32xbf16, #tpu.memory_space<vmem>>, vector<128x8xbf16>
    %c0_43 = arith.constant 0 : index
    %c16_44 = arith.constant 16 : index
    %72 = vector.load %arg19[%c0_43, %c16_44] : memref<128x32xbf16, #tpu.memory_space<vmem>>, vector<128x8xbf16>
    %cst_45 = arith.constant dense<0.000000e+00> : vector<8x128xf32>
    %73 = tpu.matmul %70, %71, %cst_45 {dimension_numbers = #tpu.dot_dimension_numbers<[1], [1], [0], [0], [0, 0, 1, 0], [], []>} : vector<8x8xbf16>, vector<128x8xbf16>, vector<8x128xf32> -> vector<8x128xf32>
    %cst_46 = arith.constant 0.353553385 : f32
    %74 = vector.broadcast %cst_46 : f32 to vector<8x128xf32>
    %75 = arith.mulf %73, %74 : vector<8x128xf32>
    %cst_47 = arith.constant 0.000000e+00 : bf16
    %76 = vector.broadcast %cst_47 : bf16 to vector<8x128xbf16>
    %77 = arith.cmpf ogt, %13, %76 : vector<8x128xbf16>
    %cst_48 = arith.constant -1.000000e+30 : f32
    %78 = vector.broadcast %cst_48 : f32 to vector<8x128xf32>
    %79 = arith.select %77, %78, %75 : vector<8x128xi1>, vector<8x128xf32>
    %cst_49 = arith.constant dense<0xFF800000> : vector<8xf32>
    %80 = vector.multi_reduction <maximumf>, %79, %cst_49 [1] : vector<8x128xf32> to vector<8xf32>
    %81 = vector.shape_cast %80 : vector<8xf32> to vector<8x1xf32>
    %82 = vector.broadcast %81 : vector<8x1xf32> to vector<8x128xf32>
    %83 = arith.subf %79, %82 : vector<8x128xf32>
    %84 = math.exp %83 : vector<8x128xf32>
    %cst_50 = arith.constant dense<0.000000e+00> : vector<8xf32>
    %85 = vector.multi_reduction <add>, %84, %cst_50 [1] : vector<8x128xf32> to vector<8xf32>
    %86 = vector.shape_cast %85 : vector<8xf32> to vector<8x1xf32>
    %87 = tpu.reciprocal %86 {approx = true} : vector<8x1xf32> -> vector<8x1xf32>
    %88 = vector.broadcast %87 : vector<8x1xf32> to vector<8x128xf32>
    %89 = arith.mulf %84, %88 : vector<8x128xf32>
    %90 = arith.truncf %89 : vector<8x128xf32> to vector<8x128xbf16>
    %c2 = arith.constant 2 : index
    %c0_51 = arith.constant 0 : index
    %c0_52 = arith.constant 0 : index
    %c0_53 = arith.constant 0 : index
    %91 = vector.load %arg17[%c2, %c0_51, %c0_52, %c0_53] : memref<4x1x8x128xbf16, #tpu.memory_space<vmem>>, vector<1x1x8x128xbf16>
    %92 = vector.shape_cast %91 : vector<1x1x8x128xbf16> to vector<8x128xbf16>
    %93 = vector.shape_cast %90 : vector<8x128xbf16> to vector<1x1x8x128xbf16>
    tpu.vector_store %arg17[%c2, %c0_51, %c0_52, %c0_53], %93 {strides = array<i32>} : memref<4x1x8x128xbf16, #tpu.memory_space<vmem>>, vector<1x1x8x128xbf16>,
    %94 = arith.truncf %89 : vector<8x128xf32> to vector<8x128xbf16>
    %cst_54 = arith.constant dense<0.000000e+00> : vector<8x8xf32>
    %95 = tpu.matmul %94, %72, %cst_54 {dimension_numbers = #tpu.dot_dimension_numbers<[1], [0], [0], [1], [0, 0, 1, 1], [], []>} : vector<8x128xbf16>, vector<128x8xbf16>, vector<8x8xf32> -> vector<8x8xf32>
    %96 = arith.truncf %95 : vector<8x8xf32> to vector<8x8xbf16>
    %c0_55 = arith.constant 0 : index
    %c16_56 = arith.constant 16 : index
    %97 = vector.load %arg20[%c0_55, %c16_56] : memref<8x32xbf16, #tpu.memory_space<vmem>>, vector<8x8xbf16>
    tpu.vector_store %arg20[%c0_55, %c16_56], %96 {strides = array<i32>} : memref<8x32xbf16, #tpu.memory_space<vmem>>, vector<8x8xbf16>,
    %98 = vector.extract_strided_slice %11 {offsets = [0, 24], sizes = [8, 8], strides = [1, 1]} : vector<8x32xbf16> to vector<8x8xbf16>
    %c0_57 = arith.constant 0 : index
    %c24 = arith.constant 24 : index
    %99 = vector.load %arg18[%c0_57, %c24] : memref<128x32xbf16, #tpu.memory_space<vmem>>, vector<128x8xbf16>
    %c0_58 = arith.constant 0 : index
    %c24_59 = arith.constant 24 : index
    %100 = vector.load %arg19[%c0_58, %c24_59] : memref<128x32xbf16, #tpu.memory_space<vmem>>, vector<128x8xbf16>
    %cst_60 = arith.constant dense<0.000000e+00> : vector<8x128xf32>
    %101 = tpu.matmul %98, %99, %cst_60 {dimension_numbers = #tpu.dot_dimension_numbers<[1], [1], [0], [0], [0, 0, 1, 0], [], []>} : vector<8x8xbf16>, vector<128x8xbf16>, vector<8x128xf32> -> vector<8x128xf32>
    %cst_61 = arith.constant 0.353553385 : f32
    %102 = vector.broadcast %cst_61 : f32 to vector<8x128xf32>
    %103 = arith.mulf %101, %102 : vector<8x128xf32>
    %cst_62 = arith.constant 0.000000e+00 : bf16
    %104 = vector.broadcast %cst_62 : bf16 to vector<8x128xbf16>
    %105 = arith.cmpf ogt, %13, %104 : vector<8x128xbf16>
    %cst_63 = arith.constant -1.000000e+30 : f32
    %106 = vector.broadcast %cst_63 : f32 to vector<8x128xf32>
    %107 = arith.select %105, %106, %103 : vector<8x128xi1>, vector<8x128xf32>
    %cst_64 = arith.constant dense<0xFF800000> : vector<8xf32>
    %108 = vector.multi_reduction <maximumf>, %107, %cst_64 [1] : vector<8x128xf32> to vector<8xf32>
    %109 = vector.shape_cast %108 : vector<8xf32> to vector<8x1xf32>
    %110 = vector.broadcast %109 : vector<8x1xf32> to vector<8x128xf32>
    %111 = arith.subf %107, %110 : vector<8x128xf32>
    %112 = math.exp %111 : vector<8x128xf32>
    %cst_65 = arith.constant dense<0.000000e+00> : vector<8xf32>
    %113 = vector.multi_reduction <add>, %112, %cst_65 [1] : vector<8x128xf32> to vector<8xf32>
    %114 = vector.shape_cast %113 : vector<8xf32> to vector<8x1xf32>
    %115 = tpu.reciprocal %114 {approx = true} : vector<8x1xf32> -> vector<8x1xf32>
    %116 = vector.broadcast %115 : vector<8x1xf32> to vector<8x128xf32>
    %117 = arith.mulf %112, %116 : vector<8x128xf32>
    %118 = arith.truncf %117 : vector<8x128xf32> to vector<8x128xbf16>
    %c3 = arith.constant 3 : index
    %c0_66 = arith.constant 0 : index
    %c0_67 = arith.constant 0 : index
    %c0_68 = arith.constant 0 : index
    %119 = vector.load %arg17[%c3, %c0_66, %c0_67, %c0_68] : memref<4x1x8x128xbf16, #tpu.memory_space<vmem>>, vector<1x1x8x128xbf16>
    %120 = vector.shape_cast %119 : vector<1x1x8x128xbf16> to vector<8x128xbf16>
    %121 = vector.shape_cast %118 : vector<8x128xbf16> to vector<1x1x8x128xbf16>
    tpu.vector_store %arg17[%c3, %c0_66, %c0_67, %c0_68], %121 {strides = array<i32>} : memref<4x1x8x128xbf16, #tpu.memory_space<vmem>>, vector<1x1x8x128xbf16>,
    %122 = arith.truncf %117 : vector<8x128xf32> to vector<8x128xbf16>
    %cst_69 = arith.constant dense<0.000000e+00> : vector<8x8xf32>
    %123 = tpu.matmul %122, %100, %cst_69 {dimension_numbers = #tpu.dot_dimension_numbers<[1], [0], [0], [1], [0, 0, 1, 1], [], []>} : vector<8x128xbf16>, vector<128x8xbf16>, vector<8x8xf32> -> vector<8x8xf32>
    %124 = arith.truncf %123 : vector<8x8xf32> to vector<8x8xbf16>
    %c0_70 = arith.constant 0 : index
    %c24_71 = arith.constant 24 : index
    %125 = vector.load %arg20[%c0_70, %c24_71] : memref<8x32xbf16, #tpu.memory_space<vmem>>, vector<8x8xbf16>
    tpu.vector_store %arg20[%c0_70, %c24_71], %124 {strides = array<i32>} : memref<8x32xbf16, #tpu.memory_space<vmem>>, vector<8x8xbf16>,
    %c0_72 = arith.constant 0 : index
    %c0_73 = arith.constant 0 : index
    %126 = vector.load %arg20[%c0_72, %c0_73] : memref<8x32xbf16, #tpu.memory_space<vmem>>, vector<8x32xbf16>
    %c0_74 = arith.constant 0 : index
    %c0_75 = arith.constant 0 : index
    %127 = vector.load %arg12[%c0_74, %c0_75] : memref<32x32xbf16, #tpu.memory_space<vmem>>, vector<32x32xbf16>
    %cst_76 = arith.constant dense<0.000000e+00> : vector<8x32xf32>
    %128 = tpu.matmul %126, %127, %cst_76 {dimension_numbers = #tpu.dot_dimension_numbers<[1], [0], [0], [1], [0, 0, 1, 1], [], []>} : vector<8x32xbf16>, vector<32x32xbf16>, vector<8x32xf32> -> vector<8x32xf32>
    %c0_77 = arith.constant 0 : index
    %c0_78 = arith.constant 0 : index
    %129 = vector.load %arg13[%c0_77, %c0_78] : memref<1x32xf32, #tpu.memory_space<vmem>>, vector<1x32xf32>
    %130 = vector.broadcast %129 : vector<1x32xf32> to vector<8x32xf32>
    %131 = arith.addf %128, %130 : vector<8x32xf32>
    %132 = arith.addf %131, %4 : vector<8x32xf32>
    %c0_79 = arith.constant 0 : index
    %c0_80 = arith.constant 0 : index
    %133 = vector.load %arg14[%c0_79, %c0_80] : memref<1x32xf32, #tpu.memory_space<vmem>>, vector<1x32xf32>
    %c0_81 = arith.constant 0 : index
    %c0_82 = arith.constant 0 : index
    %134 = vector.load %arg15[%c0_81, %c0_82] : memref<1x32xf32, #tpu.memory_space<vmem>>, vector<1x32xf32>
    %cst_83 = arith.constant dense<0.000000e+00> : vector<8xf32>
    %135 = vector.multi_reduction <add>, %132, %cst_83 [1] : vector<8x32xf32> to vector<8xf32>
    %136 = vector.shape_cast %135 : vector<8xf32> to vector<8x1xf32>
    %cst_84 = arith.constant 3.200000e+01 : f32
    %137 = vector.broadcast %cst_84 : f32 to vector<8x1xf32>
    %138 = arith.divf %136, %137 : vector<8x1xf32>
    %139 = vector.broadcast %138 : vector<8x1xf32> to vector<8x32xf32>
    %140 = arith.subf %132, %139 : vector<8x32xf32>
    %141 = arith.mulf %140, %140 : vector<8x32xf32>
    %cst_85 = arith.constant dense<0.000000e+00> : vector<8xf32>
    %142 = vector.multi_reduction <add>, %141, %cst_85 [1] : vector<8x32xf32> to vector<8xf32>
    %143 = vector.shape_cast %142 : vector<8xf32> to vector<8x1xf32>
    %cst_86 = arith.constant 3.200000e+01 : f32
    %144 = vector.broadcast %cst_86 : f32 to vector<8x1xf32>
    %145 = arith.divf %143, %144 : vector<8x1xf32>
    %146 = vector.broadcast %138 : vector<8x1xf32> to vector<8x32xf32>
    %147 = arith.subf %132, %146 : vector<8x32xf32>
    %cst_87 = arith.constant 9.99999974E-6 : f32
    %148 = vector.broadcast %cst_87 : f32 to vector<8x1xf32>
    %149 = arith.addf %145, %148 : vector<8x1xf32>
    %150 = math.rsqrt %149 : vector<8x1xf32>
    %151 = vector.broadcast %150 : vector<8x1xf32> to vector<8x32xf32>
    %152 = arith.mulf %147, %151 : vector<8x32xf32>
    %153 = vector.broadcast %133 : vector<1x32xf32> to vector<8x32xf32>
    %154 = arith.mulf %152, %153 : vector<8x32xf32>
    %155 = vector.broadcast %134 : vector<1x32xf32> to vector<8x32xf32>
    %156 = arith.addf %154, %155 : vector<8x32xf32>
    %c0_88 = arith.constant 0 : index
    %c0_89 = arith.constant 0 : index
    %c0_90 = arith.constant 0 : index
    %157 = vector.load %arg5[%c0_88, %c0_89, %c0_90] : memref<1x8x1xbf16, #tpu.memory_space<vmem>>, vector<1x8x1xbf16>
    %158 = vector.shape_cast %157 : vector<1x8x1xbf16> to vector<8x1xbf16>
    %159 = arith.extf %158 : vector<8x1xbf16> to vector<8x1xf32>
    %160 = vector.broadcast %159 : vector<8x1xf32> to vector<8x32xf32>
    %161 = arith.mulf %156, %160 : vector<8x32xf32>
    %c0_91 = arith.constant 0 : index
    %c0_92 = arith.constant 0 : index
    %c0_93 = arith.constant 0 : index
    %162 = vector.load %arg16[%c0_91, %c0_92, %c0_93] : memref<1x8x32xf32, #tpu.memory_space<vmem>>, vector<1x8x32xf32>
    %163 = vector.shape_cast %162 : vector<1x8x32xf32> to vector<8x32xf32>
    %164 = vector.shape_cast %161 : vector<8x32xf32> to vector<1x8x32xf32>
    tpu.vector_store %arg16[%c0_91, %c0_92, %c0_93], %164 {strides = array<i32>} : memref<1x8x32xf32, #tpu.memory_space<vmem>>, vector<1x8x32xf32>,
    return
  }
  func.func @transform_0(%arg0: i32, %arg1: i32) -> (i32, i32, i32) {
    %c0_i32 = arith.constant 0 : i32
    %c0_i32_0 = arith.constant 0 : i32
    return %arg0, %arg1, %c0_i32 : i32, i32, i32
  }
  func.func @transform_1(%arg0: i32, %arg1: i32) -> (i32, i32, i32) {
    %c0_i32 = arith.constant 0 : i32
    %c0_i32_0 = arith.constant 0 : i32
    %c0_i32_1 = arith.constant 0 : i32
    return %arg0, %c0_i32, %c0_i32_0 : i32, i32, i32
  }
  func.func @transform_2(%arg0: i32, %arg1: i32) -> (i32, i32, i32) {
    %c0_i32 = arith.constant 0 : i32
    %c0_i32_0 = arith.constant 0 : i32
    return %arg0, %arg1, %c0_i32 : i32, i32, i32
  }
  func.func @transform_3(%arg0: i32, %arg1: i32) -> (i32, i32, i32) {
    %c0_i32 = arith.constant 0 : i32
    %c0_i32_0 = arith.constant 0 : i32
    return %arg0, %arg1, %c0_i32 : i32, i32, i32
  }
  func.func @transform_4(%arg0: i32, %arg1: i32) -> (i32, i32) {
    %c0_i32 = arith.constant 0 : i32
    %c0_i32_0 = arith.constant 0 : i32
    %c0_i32_1 = arith.constant 0 : i32
    return %c0_i32, %c0_i32_0 : i32, i32
  }
  func.func @transform_5(%arg0: i32, %arg1: i32) -> (i32, i32) {
    %c0_i32 = arith.constant 0 : i32
    %c0_i32_0 = arith.constant 0 : i32
    %c0_i32_1 = arith.constant 0 : i32
    return %c0_i32, %c0_i32_0 : i32, i32
  }
  func.func @transform_6(%arg0: i32, %arg1: i32) -> (i32, i32) {
    %c0_i32 = arith.constant 0 : i32
    %c0_i32_0 = arith.constant 0 : i32
    %c0_i32_1 = arith.constant 0 : i32
    return %c0_i32, %c0_i32_0 : i32, i32
  }
  func.func @transform_7(%arg0: i32, %arg1: i32) -> (i32, i32) {
    %c0_i32 = arith.constant 0 : i32
    %c0_i32_0 = arith.constant 0 : i32
    %c0_i32_1 = arith.constant 0 : i32
    return %c0_i32, %c0_i32_0 : i32, i32
  }
  func.func @transform_8(%arg0: i32, %arg1: i32) -> (i32, i32) {
    %c0_i32 = arith.constant 0 : i32
    %c0_i32_0 = arith.constant 0 : i32
    %c0_i32_1 = arith.constant 0 : i32
    return %c0_i32, %c0_i32_0 : i32, i32
  }
  func.func @transform_9(%arg0: i32, %arg1: i32) -> (i32, i32) {
    %c0_i32 = arith.constant 0 : i32
    %c0_i32_0 = arith.constant 0 : i32
    %c0_i32_1 = arith.constant 0 : i32
    return %c0_i32, %c0_i32_0 : i32, i32
  }
  func.func @transform_10(%arg0: i32, %arg1: i32) -> (i32, i32) {
    %c0_i32 = arith.constant 0 : i32
    %c0_i32_0 = arith.constant 0 : i32
    %c0_i32_1 = arith.constant 0 : i32
    return %c0_i32, %c0_i32_0 : i32, i32
  }
  func.func @transform_11(%arg0: i32, %arg1: i32) -> (i32, i32) {
    %c0_i32 = arith.constant 0 : i32
    %c0_i32_0 = arith.constant 0 : i32
    %c0_i32_1 = arith.constant 0 : i32
    return %c0_i32, %c0_i32_0 : i32, i32
  }
  func.func @transform_12(%arg0: i32, %arg1: i32) -> (i32, i32) {
    %c0_i32 = arith.constant 0 : i32
    %c0_i32_0 = arith.constant 0 : i32
    %c0_i32_1 = arith.constant 0 : i32
    return %c0_i32, %c0_i32_0 : i32, i32
  }
  func.func @transform_13(%arg0: i32, %arg1: i32) -> (i32, i32) {
    %c0_i32 = arith.constant 0 : i32
    %c0_i32_0 = arith.constant 0 : i32
    %c0_i32_1 = arith.constant 0 : i32
    return %c0_i32, %c0_i32_0 : i32, i32
  }
  func.func @transform_14(%arg0: i32, %arg1: i32) -> (i32, i32, i32) {
    %c0_i32 = arith.constant 0 : i32
    %c0_i32_0 = arith.constant 0 : i32
    return %arg0, %arg1, %c0_i32 : i32, i32, i32
  }
  func.func @transform_15(%arg0: i32, %arg1: i32) -> (i32, i32, i32, i32) {
    %c0_i32 = arith.constant 0 : i32
    %c0_i32_0 = arith.constant 0 : i32
    %c0_i32_1 = arith.constant 0 : i32
    return %c0_i32, %arg0, %arg1, %c0_i32_0 : i32, i32, i32, i32
  }
}

module attributes {stable_mosaic.version = 11 : i64} {
  func.func @ffn_kernel(%arg0: i32, %arg1: i32, %arg2: memref<1x8x32xf32, #tpu.memory_space<vmem>>, %arg3: memref<1x8x1xbf16, #tpu.memory_space<vmem>>, %arg4: memref<32x64xbf16, #tpu.memory_space<vmem>>, %arg5: memref<1x64xf32, #tpu.memory_space<vmem>>, %arg6: memref<64x32xbf16, #tpu.memory_space<vmem>>, %arg7: memref<1x32xf32, #tpu.memory_space<vmem>>, %arg8: memref<1x32xf32, #tpu.memory_space<vmem>>, %arg9: memref<1x32xf32, #tpu.memory_space<vmem>>, %arg10: memref<1x8x32xf32, #tpu.memory_space<vmem>>) attributes {dimension_semantics = [#tpu.dimension_semantics<parallel>, #tpu.dimension_semantics<parallel>], iteration_bounds = array<i64: 2, 1>, scalar_prefetch = 0 : i64, scratch_operands = 0 : i64, tpu.core_type = #tpu.core_type<tc>, window_params = [{transform_indices = @transform_0, window_bounds = array<i64: 1, 8, 32>}, {transform_indices = @transform_1, window_bounds = array<i64: 1, 8, 1>}, {pipeline_mode = #tpu.pipeline_mode<synchronous>, transform_indices = @transform_2, window_bounds = array<i64: 32, 64>}, {pipeline_mode = #tpu.pipeline_mode<synchronous>, transform_indices = @transform_3, window_bounds = array<i64: 1, 64>}, {pipeline_mode = #tpu.pipeline_mode<synchronous>, transform_indices = @transform_4, window_bounds = array<i64: 64, 32>}, {pipeline_mode = #tpu.pipeline_mode<synchronous>, transform_indices = @transform_5, window_bounds = array<i64: 1, 32>}, {pipeline_mode = #tpu.pipeline_mode<synchronous>, transform_indices = @transform_6, window_bounds = array<i64: 1, 32>}, {pipeline_mode = #tpu.pipeline_mode<synchronous>, transform_indices = @transform_7, window_bounds = array<i64: 1, 32>}, {transform_indices = @transform_8, window_bounds = array<i64: 1, 8, 32>}]} {
    %c0 = arith.constant 0 : index
    %c0_0 = arith.constant 0 : index
    %c0_1 = arith.constant 0 : index
    %0 = vector.load %arg2[%c0, %c0_0, %c0_1] : memref<1x8x32xf32, #tpu.memory_space<vmem>>, vector<1x8x32xf32>
    %1 = vector.shape_cast %0 : vector<1x8x32xf32> to vector<8x32xf32>
    %2 = arith.truncf %1 : vector<8x32xf32> to vector<8x32xbf16>
    %c0_2 = arith.constant 0 : index
    %c0_3 = arith.constant 0 : index
    %3 = vector.load %arg4[%c0_2, %c0_3] : memref<32x64xbf16, #tpu.memory_space<vmem>>, vector<32x64xbf16>
    %cst = arith.constant dense<0.000000e+00> : vector<8x64xf32>
    %4 = tpu.matmul %2, %3, %cst {dimension_numbers = #tpu.dot_dimension_numbers<[1], [0], [0], [1], [0, 0, 1, 1], [], []>} : vector<8x32xbf16>, vector<32x64xbf16>, vector<8x64xf32> -> vector<8x64xf32>
    %c0_4 = arith.constant 0 : index
    %c0_5 = arith.constant 0 : index
    %5 = vector.load %arg5[%c0_4, %c0_5] : memref<1x64xf32, #tpu.memory_space<vmem>>, vector<1x64xf32>
    %6 = vector.broadcast %5 : vector<1x64xf32> to vector<8x64xf32>
    %7 = arith.addf %4, %6 : vector<8x64xf32>
    %cst_6 = arith.constant 0.000000e+00 : f32
    %8 = vector.broadcast %cst_6 : f32 to vector<8x64xf32>
    %9 = arith.maximumf %7, %8 : vector<8x64xf32>
    %10 = arith.truncf %9 : vector<8x64xf32> to vector<8x64xbf16>
    %c0_7 = arith.constant 0 : index
    %c0_8 = arith.constant 0 : index
    %11 = vector.load %arg6[%c0_7, %c0_8] : memref<64x32xbf16, #tpu.memory_space<vmem>>, vector<64x32xbf16>
    %cst_9 = arith.constant dense<0.000000e+00> : vector<8x32xf32>
    %12 = tpu.matmul %10, %11, %cst_9 {dimension_numbers = #tpu.dot_dimension_numbers<[1], [0], [0], [1], [0, 0, 1, 1], [], []>} : vector<8x64xbf16>, vector<64x32xbf16>, vector<8x32xf32> -> vector<8x32xf32>
    %c0_10 = arith.constant 0 : index
    %c0_11 = arith.constant 0 : index
    %13 = vector.load %arg7[%c0_10, %c0_11] : memref<1x32xf32, #tpu.memory_space<vmem>>, vector<1x32xf32>
    %14 = vector.broadcast %13 : vector<1x32xf32> to vector<8x32xf32>
    %15 = arith.addf %12, %14 : vector<8x32xf32>
    %16 = arith.addf %15, %1 : vector<8x32xf32>
    %c0_12 = arith.constant 0 : index
    %c0_13 = arith.constant 0 : index
    %17 = vector.load %arg8[%c0_12, %c0_13] : memref<1x32xf32, #tpu.memory_space<vmem>>, vector<1x32xf32>
    %c0_14 = arith.constant 0 : index
    %c0_15 = arith.constant 0 : index
    %18 = vector.load %arg9[%c0_14, %c0_15] : memref<1x32xf32, #tpu.memory_space<vmem>>, vector<1x32xf32>
    %cst_16 = arith.constant dense<0.000000e+00> : vector<8xf32>
    %19 = vector.multi_reduction <add>, %16, %cst_16 [1] : vector<8x32xf32> to vector<8xf32>
    %20 = vector.shape_cast %19 : vector<8xf32> to vector<8x1xf32>
    %cst_17 = arith.constant 3.200000e+01 : f32
    %21 = vector.broadcast %cst_17 : f32 to vector<8x1xf32>
    %22 = arith.divf %20, %21 : vector<8x1xf32>
    %23 = vector.broadcast %22 : vector<8x1xf32> to vector<8x32xf32>
    %24 = arith.subf %16, %23 : vector<8x32xf32>
    %25 = arith.mulf %24, %24 : vector<8x32xf32>
    %cst_18 = arith.constant dense<0.000000e+00> : vector<8xf32>
    %26 = vector.multi_reduction <add>, %25, %cst_18 [1] : vector<8x32xf32> to vector<8xf32>
    %27 = vector.shape_cast %26 : vector<8xf32> to vector<8x1xf32>
    %cst_19 = arith.constant 3.200000e+01 : f32
    %28 = vector.broadcast %cst_19 : f32 to vector<8x1xf32>
    %29 = arith.divf %27, %28 : vector<8x1xf32>
    %30 = vector.broadcast %22 : vector<8x1xf32> to vector<8x32xf32>
    %31 = arith.subf %16, %30 : vector<8x32xf32>
    %cst_20 = arith.constant 9.99999974E-6 : f32
    %32 = vector.broadcast %cst_20 : f32 to vector<8x1xf32>
    %33 = arith.addf %29, %32 : vector<8x1xf32>
    %34 = math.rsqrt %33 : vector<8x1xf32>
    %35 = vector.broadcast %34 : vector<8x1xf32> to vector<8x32xf32>
    %36 = arith.mulf %31, %35 : vector<8x32xf32>
    %37 = vector.broadcast %17 : vector<1x32xf32> to vector<8x32xf32>
    %38 = arith.mulf %36, %37 : vector<8x32xf32>
    %39 = vector.broadcast %18 : vector<1x32xf32> to vector<8x32xf32>
    %40 = arith.addf %38, %39 : vector<8x32xf32>
    %c0_21 = arith.constant 0 : index
    %c0_22 = arith.constant 0 : index
    %c0_23 = arith.constant 0 : index
    %41 = vector.load %arg3[%c0_21, %c0_22, %c0_23] : memref<1x8x1xbf16, #tpu.memory_space<vmem>>, vector<1x8x1xbf16>
    %42 = vector.shape_cast %41 : vector<1x8x1xbf16> to vector<8x1xbf16>
    %43 = arith.extf %42 : vector<8x1xbf16> to vector<8x1xf32>
    %44 = vector.broadcast %43 : vector<8x1xf32> to vector<8x32xf32>
    %45 = arith.mulf %40, %44 : vector<8x32xf32>
    %c0_24 = arith.constant 0 : index
    %c0_25 = arith.constant 0 : index
    %c0_26 = arith.constant 0 : index
    %46 = vector.load %arg10[%c0_24, %c0_25, %c0_26] : memref<1x8x32xf32, #tpu.memory_space<vmem>>, vector<1x8x32xf32>
    %47 = vector.shape_cast %46 : vector<1x8x32xf32> to vector<8x32xf32>
    %48 = vector.shape_cast %45 : vector<8x32xf32> to vector<1x8x32xf32>
    tpu.vector_store %arg10[%c0_24, %c0_25, %c0_26], %48 {strides = array<i32>} : memref<1x8x32xf32, #tpu.memory_space<vmem>>, vector<1x8x32xf32>,
    return
  }
  func.func @transform_0(%arg0: i32, %arg1: i32) -> (i32, i32, i32) {
    %c0_i32 = arith.constant 0 : i32
    %c0_i32_0 = arith.constant 0 : i32
    return %arg0, %arg1, %c0_i32 : i32, i32, i32
  }
  func.func @transform_1(%arg0: i32, %arg1: i32) -> (i32, i32, i32) {
    %c0_i32 = arith.constant 0 : i32
    %c0_i32_0 = arith.constant 0 : i32
    return %arg0, %arg1, %c0_i32 : i32, i32, i32
  }
  func.func @transform_2(%arg0: i32, %arg1: i32) -> (i32, i32) {
    %c0_i32 = arith.constant 0 : i32
    %c0_i32_0 = arith.constant 0 : i32
    %c0_i32_1 = arith.constant 0 : i32
    return %c0_i32, %c0_i32_0 : i32, i32
  }
  func.func @transform_3(%arg0: i32, %arg1: i32) -> (i32, i32) {
    %c0_i32 = arith.constant 0 : i32
    %c0_i32_0 = arith.constant 0 : i32
    %c0_i32_1 = arith.constant 0 : i32
    return %c0_i32, %c0_i32_0 : i32, i32
  }
  func.func @transform_4(%arg0: i32, %arg1: i32) -> (i32, i32) {
    %c0_i32 = arith.constant 0 : i32
    %c0_i32_0 = arith.constant 0 : i32
    %c0_i32_1 = arith.constant 0 : i32
    return %c0_i32, %c0_i32_0 : i32, i32
  }
  func.func @transform_5(%arg0: i32, %arg1: i32) -> (i32, i32) {
    %c0_i32 = arith.constant 0 : i32
    %c0_i32_0 = arith.constant 0 : i32
    %c0_i32_1 = arith.constant 0 : i32
    return %c0_i32, %c0_i32_0 : i32, i32
  }
  func.func @transform_6(%arg0: i32, %arg1: i32) -> (i32, i32) {
    %c0_i32 = arith.constant 0 : i32
    %c0_i32_0 = arith.constant 0 : i32
    %c0_i32_1 = arith.constant 0 : i32
    return %c0_i32, %c0_i32_0 : i32, i32
  }
  func.func @transform_7(%arg0: i32, %arg1: i32) -> (i32, i32) {
    %c0_i32 = arith.constant 0 : i32
    %c0_i32_0 = arith.constant 0 : i32
    %c0_i32_1 = arith.constant 0 : i32
    return %c0_i32, %c0_i32_0 : i32, i32
  }
  func.func @transform_8(%arg0: i32, %arg1: i32) -> (i32, i32, i32) {
    %c0_i32 = arith.constant 0 : i32
    %c0_i32_0 = arith.constant 0 : i32
    return %arg0, %arg1, %c0_i32 : i32, i32, i32
  }
}

</mosaic_0001>

<bundles_post_ra>
// kernel: decoder_layer_forward.5
= control target key start
LH: loop header
LB: loop body
LE: loop exit
PB: predicated region body
PF: predicated region fallthrough
CT: control target
= control target key end

     0   :  { %13 = vsyncpa [#allocation3], 0  ;;  %s1052_s0 = inlined_call_operand.vmem [shape: f32[2,8,32], index: 0, kind: input, shape index: {}]   ;;  %s1053_s1 = inlined_call_operand.vmem [shape: bf16[2,8,1], index: 1, kind: input, shape index: {}]   ;;  %s1054_s2 = inlined_call_operand.vmem [shape: bf16[32,64], index: 2, kind: input, shape index: {}]   ;;  %s1055_s3 = inlined_call_operand.vmem [shape: f32[1,64], index: 3, kind: input, shape index: {}]   ;;  %s1056_s4 = inlined_call_operand.vmem [shape: bf16[64,32], index: 4, kind: input, shape index: {}]   ;;  %s1057_s5 = inlined_call_operand.vmem [shape: f32[1,32], index: 5, kind: input, shape index: {}]   ;;  %s1058_s6 = inlined_call_operand.vmem [shape: f32[1,32], index: 6, kind: input, shape index: {}]   ;;  %s1059_s7 = inlined_call_operand.vmem [shape: f32[1,32], index: 7, kind: input, shape index: {}]   ;;  %s1060_s8 = inlined_call_operand.hbm [shape: f32[2,8,32], index: 8, kind: output, shape index: {}]  }
   0x1   :  { %15 = vsyncpa [#allocation3 + $0x1], 0  ;;  %s899_s27 = smov 0   ;;  %s901_s28 = smov 0  }
   0x2   :  { %s903_s29 = smov 0   ;;  %s905_s30 = smov 0  }
   0x3   :  { %s907_s9 = smov 0   ;;  %s909_s10 = smov 0  }
   0x4 LB: > { %s650_s11 = sadd.s32 4294967295, %s848_s10   ;;  %s651_s12 = sadd.s32 4294967294, %s848_s10   ;;  %s848_s10 = sphi %s909_s10, %s21_s10   ;;  %s844_s9 = sphi %s907_s9, %s1067_s9   ;;  %s840_s30 = sphi %s905_s30, %s1066_s30   ;;  %s836_s29 = sphi %s903_s29, %s1065_s29   ;;  %s832_s28 = sphi %s901_s28, %s1064_s28   ;;  %s828_s27 = sphi %s899_s27, %s1063_s27  }
   0x5   : > { %s33_s13 = sadd.s32 1, %s844_s9  ;;  %s224_s14 = sadd.s32 1, %s836_s29 }
   0x6   : > { %p35_p0 = scmp.ge.s32.totalorder %s33_s13, 2  ;;  %p234_p1 = scmp.ne.s32.totalorder %s836_s29, %s832_s28 }
   0x7   : > { %p235_p2 = scmp.eq.s32.totalorder %s650_s11, 1  ;;  %p240_p3 = scmp.ne.s32.totalorder %s832_s28, %s828_s27 }
   0x8   : > { %s1069_s13 = smov (%p35_p0, %s33_s13), 0  ;;  %p241_p5 = scmp.eq.s32.totalorder %s651_s12, 1 }
   0x9   : > { %p939_p4 = por %p235_p2, %p234_p1  ;;  %s219_s16 = ssub.s32 %s844_s9, %s1069_s13 }
   0xa   : > { %p654_p6 = scmp.ge.s32.totalorder %s848_s10, 1  ;;  %p222_p7 = scmp.eq.s32.totalorder %s219_s16, 0 }
   0xb   : > { %p946_p8 = por %p241_p5, %p240_p3  ;;  %p297_p9 = scmp.lt.s32.totalorder %s848_s10, 3 }
   0xc   : > { %s952_s18 = scalar_select %p222_p7, %s836_s29, %s224_s14  }
   0xd   : > { %p298_p10 = pnand %p654_p6, %p297_p9 }
   0xe   : > { %v762_v0 = vld [vmem:[%s1054_s2] sm:$0xff] (!%p298_p10)   ;;  %v850_v1 = vmov (!%p298_p10), 0.0   ;;  %v763_v2 = vld [vmem:[%s1054_s2 + $0x8] sm:$0xff] (!%p298_p10)   ;;  %vm851_vm0 = vmmov (!%p298_p10), 0   ;;  %p340_p11 = scmp.lt.s32.totalorder (!%p298_p10), %s840_s30, 1  ;;  %vm380_vm1 = vcmask (!%p298_p10), 261120  }
   0xf   : > { %301 = sbr.rel (%p298_p10) target bundleno = 792 (0x318), region = 52  ;;  %682 = vmatprep.subr.bf16.mxu0 (!%p298_p10), %v850_v1  ;;  %690 = vmatprep.subr.bf16.mxu1 (!%p298_p10), %v850_v1  ;;  %v764_v3 = vld [vmem:[%s1056_s4] sm:$0xff] (!%p298_p10)   ;;  %v765_v4 = vld [vmem:[%s1056_s4 + $0x8] sm:$0xff] (!%p298_p10)   ;;  %v766_v7 = vld [vmem:[%s1056_s4 + $0x10] sm:$0xff] (!%p298_p10)   ;;  %vm465_vm2 = vcmask (!%p298_p10), 523264   ;;  %v852_v25 = vmov (!%p298_p10), 0  }
  0x10   : > { %683 = vmatpush3.bf16.msra.mxu0 (!%p298_p10), %v762_v0  ;;  %686 = vmatprep.mubr.msk.bf16.mxu0 (!%p298_p10), %vm851_vm0, %v850_v1  ;;  %v767_v8 = vld [vmem:[%s1056_s4 + $0x18] sm:$0xff] (!%p298_p10)   ;;  %v658_v9 = vld [vmem:[%s1055_s3] ss:$0 sm:$0xff] (!%p298_p10)  ;;  %s671_s11 = sshll.u32 (!%p298_p10), %s840_s30, 7 }
  0x11   : > { %684 = vmatprep.subr.bf16.mxu0 (!%p298_p10), %v850_v1  ;;  %698 = vmatprep.mubr.msk.bf16.mxu1 (!%p298_p10), %vm851_vm0, %v850_v1  ;;  %v662_v17 = vld [vmem:[%s1057_s5] ss:$0 sm:$0xff] (!%p298_p10) }
  0x12   : > { %691 = vmatpush3.bf16.msra.mxu1 (!%p298_p10), %v764_v3  ;;  %760 = vset.pattern.permute.xlu1 (!%p298_p10), %v852_v25  ;;  %v668_v37 = vld [vmem:[%s1058_s6] ss:$0 sm:$0xff] (!%p298_p10) }
  0x13   : > { %692 = vmatprep.subr.bf16.mxu1 (!%p298_p10), %v850_v1  ;;  %761 = vset.pattern.permute.xlu0 (!%p298_p10), %v852_v25  ;;  %v669_v39 = vld [vmem:[%s1059_s7] ss:$0 sm:$0xff] (!%p298_p10) }
  0x14   : > { %685 = vmatpush3.bf16.msra.mxu0 (!%p298_p10), %v763_v2 }
  0x16   : > { %s965_s25 = scalar_select %p340_p11, %s840_s30, 1  ;;  %693 = vmatpush3.bf16.msra.mxu1 %v765_v4 }
  0x17   : > { %694 = vmatprep.subr.bf16.mxu1 %v850_v1  ;;  %s853_s30 = smov [#allocation2]  }
  0x18   : > { %s656_s12 = sshll.u32 %s965_s25, 3  ;;  %s657_s14 = sshll.u32 %s965_s25, 2 }
  0x19   : > { %s346_s19 = scalar_lea.vmem %s1052_s0, %s656_s12  ;;  %s353_s20 = scalar_lea.vmem %s1053_s1, %s657_s14 }
  0x1a   : > { %v355_v5 = vld [vmem:[%s346_s19] sm:$0xff]  ;;  %695 = vmatpush3.bf16.msra.mxu1 %v766_v7  ;;  %s337_s25 = sand.u32 1, %s832_s28  }
  0x1b   : > { %v356_v6 = vpack.c.bf16 %v355_v5, %v355_v5  ;;  %696 = vmatprep.subr.bf16.mxu1 %v850_v1  ;;  %v540_v26 = vld [vmem:[%s353_s20] sm:$0xf]  ;;  %s655_s21 = sshll.u32 %s337_s25, 3  ;;  %s1004_s20 = scalar_lea.hbm %s1060_s8, %s671_s11 }
  0x1c   : > { %v541_v27 = vunpack.c.l.bf16 %v540_v26  ;;  %s339_s12 = scalar_lea.vmem [#allocation2], %s655_s21  ;;  %s550_s22 = scalar_lea.sflag [#allocation3], %s337_s25 }
  0x1d   : > { %687 = vmatmul.mubr.msk.bf16.vlgmr.msra.gmra.mrb[0].mxu0 %vm380_vm1, %v356_v6  ;;  %s564_s14 = sshll.u32 %s339_s12, 4  ;;  %s774_s21 = sshll.u32 %s853_s30, 4  ;;  %s1006_s14 = int_to_ptr.vmem [resolvable:$true] %s564_s14  ;;  %s775_s21 = int_to_ptr.vmem [resolvable:$false] %s774_s21 }
  0x1e   : > { %697 = vmatpush3.bf16.msra.mxu1 %v767_v8  ;;  %544 = vperm.xlu1 %760, %v541_v27   ;;  %s770_s23 = scalar_lea.vmem %s1006_s14, 128  ;;  %s776_s24 = scalar_lea.vmem %s775_s21, 256 }
  0x1f   : > { %p771_p12 = scmp.ne.s32.totalorder %s1006_s14, %s770_s23  ;;  %p777_p1 = scmp.lt.s32.totalorder %s1006_s14, %s775_s21 }
  0x20   : > { %p778_p2 = scmp.lt.s32.totalorder %s776_s24, %s770_s23 }
  0x21   : > { %p772_p13 = pnand %p771_p12, %p939_p4 }
  0x22   : > { %p779_p3 = por %p778_p2, %p777_p1 }
  0x23   : > { %p773_p0 = pneg %p772_p13 }
  0x25   : > { %p780_p5 = pnand %p779_p3, %p773_p0 }
  0x9d   : > { %v545_v41 = vpop.permute.xlu1 %544 }
  0xf0   : > { %v418_v10 = vpop.f32.mrb[0].mxu0 }
  0xf1   : > { %v419_v11 = vadd.f32 %v658_v9, %v418_v10  ;;  %v688_v12 = vpop.f32.mrb[1].mxu0 }
  0xf2   : > { %v421_v13 = vpop.f32.mrb[2].mxu0 }
  0xf3   : > { %v424_v14 = vmax.f32 %v419_v11, 0.0  ;;  %v689_v15 = vpop.f32.mrb[3].mxu0 }
  0xf5   : > { %v425_v16 = vpack.c.bf16 %v424_v14, %v424_v14 }
  0xf7   : > { %699 = vmatmul.mubr.msk.bf16.vlgmr.msra.gmra.mrb[0].mxu1 %vm465_vm2, %v425_v16 }
 0x1ca   : > { %v503_v18 = vpop.f32.mrb[0].mxu1 }
 0x1cb   : > { %v504_v19 = vadd.f32 %v662_v17, %v503_v18  ;;  %v700_v20 = vpop.f32.mrb[1].mxu1 }
 0x1cc   : > { %v506_v21 = vpop.f32.mrb[2].mxu1 }
 0x1cd   : > { %v701_v22 = vpop.f32.mrb[3].mxu1  ;;  %v509_v23 = vadd.f32 %v504_v19, %v355_v5 }
 0x1cf   : > { %v512_v24 = vsel %vm380_vm1, %v509_v23, 0.0 }
 0x1d0   : > { %513 = vadd.xlane.f32.xlu0 %v512_v24 }
 0x25d   : > { %v514_v28 = vpop.xlane.xlu0 %513 }
 0x25e   : > { %v516_v29 = vmul.f32 0.03125, %v514_v28 }
 0x260   : > { %v517_v30 = vsub.f32 %v509_v23, %v516_v29 }
 0x262   : > { %v518_v31 = vmul.f32 %v517_v30, %v517_v30 }
 0x264   : > { %v519_v32 = vsel %vm380_vm1, %v518_v31, 0.0 }
 0x265   : > { %520 = vadd.xlane.f32.xlu0 %v519_v32 }
 0x2f2   : > { %v521_v33 = vpop.xlane.xlu0 %520 }
 0x2f3   : > { %v522_v34 = vmul.f32 0.03125, %v521_v33 }
 0x2f5   : > { %v523_v35 = vadd.f32 1e-05, %v522_v34 }
 0x2f7   : > { %768 = vrsqrt.f32 %v523_v35 }
 0x301   : > { %v769_v36 = vpop.eup %768 }
 0x302   : > { %v525_v38 = vmul.f32 %v769_v36, %v517_v30 }
 0x304   : > { %v532_v40 = vmul.f32 %v668_v37, %v525_v38 }
 0x306   : > { %v539_v42 = vadd.f32 %v669_v39, %v532_v40 }
 0x308   : > { %v547_v43 = vmul.f32 %v545_v41, %v539_v42 }
 0x30a   : > { %548 = vst.msk [vmem:[%s339_s12] sm:$0xff] %vm380_vm1, %v547_v43 }
 0x30b   : > { %783 = shalt.err (!%p780_p5)
}
 0x30c   : > { %s784_s25 = scalar_lea.hbm %s1004_s20, 128  ;;  %s788_s12 = scalar_lea.hbm %s1060_s8, 256 }
 0x30d   : > { %p785_p6 = scmp.ne.s32.totalorder %s1004_s20, %s784_s25  ;;  %p789_p10 = scmp.lt.u32.totalorder %s1004_s20, %s1060_s8 }
 0x30e   : > { %p790_p11 = scmp.lt.u32.totalorder %s788_s12, %s784_s25  ;;  %p792_p13 = scmp.lt.u32.totalorder %s784_s25, %s1004_s20 }
 0x30f   : > { %p786_p7 = pnand %p785_p6, %p939_p4 }
 0x310   : > { %p791_p12 = por %p790_p11, %p789_p10 }
 0x311   : > { %p787_p9 = pneg %p786_p7 }
 0x312   : > { %p793_p0 = por %p792_p13, %p791_p12 }
 0x314   : > { %p794_p1 = pnand %p793_p0, %p787_p9 }
 0x316   : > { %797 = shalt.err (!%p794_p1)
}
 0x317   : > { %702 = dma.vmem_to_hbm [thread:$0]  (%p939_p4), %s1006_s14, 128, %s1004_s20, %s550_s22  }
 0x318 PF: > { %p708_p2 = scmp.ge.s32.totalorder %s848_s10, 2  ;;  %s576_s23 = sand.u32 1, %s828_s27  }
 0x319   : > { %s577_s30 = scalar_lea.sflag [#allocation3], %s576_s23 }
 0x31a   : > { %p705_p3 = pnand %p708_p2, %p946_p8 }
 0x31c   : > { %823 = dma.done.wait (!%p705_p3), %s577_s30, 128  }
 0x31d   : > { %825 = vsyncadd (!%p705_p3), %s577_s30, 4294967168  ;;  %s21_s10 = sadd.s32 1, %s848_s10   ;;  %s1063_s27 = smov %s832_s28 }
 0x31e   : > { %p18_p5 = scmp.ge.s32.totalorder %s21_s10, 4   ;;  %s1064_s28 = smov %s836_s29 }
 0x31f   : > { %s1065_s29 = smov %s952_s18  ;;  %s1066_s30 = smov %s844_s9 }
 0x320   : > { %s1067_s9 = smov %s1069_s13  ;;  %20 = sbr.rel (!%p18_p5) target bundleno = 4 (0x4), region = 90 }
 0x327   :  { %582 = vsyncpa [#allocation3], 1 }
 0x328   :  { %584 = vsyncpa [#allocation3 + $0x1], 1 }

// kernel: decoder_layer_forward.3
= control target key start
LH: loop header
LB: loop body
LE: loop exit
PB: predicated region body
PF: predicated region fallthrough
CT: control target
= control target key end

     0   :  { %s3240_s0 = inlined_call_operand.vmem [shape: f32[2,8,32], index: 0, kind: input, shape index: {}]   ;;  %s3241_s1 = inlined_call_operand.vmem [shape: f32[2,128,32], index: 1, kind: input, shape index: {}]   ;;  %s3242_s2 = inlined_call_operand.vmem [shape: bf16[2,8,128], index: 2, kind: input, shape index: {}]   ;;  %s3243_s3 = inlined_call_operand.vmem [shape: bf16[2,8,1], index: 3, kind: input, shape index: {}]   ;;  %s3244_s4 = inlined_call_operand.vmem [shape: bf16[32,32], index: 4, kind: input, shape index: {}]   ;;  %s3245_s5 = inlined_call_operand.vmem [shape: f32[1,32], index: 5, kind: input, shape index: {}]   ;;  %s3246_s6 = inlined_call_operand.vmem [shape: bf16[32,32], index: 6, kind: input, shape index: {}]   ;;  %s3247_s7 = inlined_call_operand.vmem [shape: f32[1,32], index: 7, kind: input, shape index: {}]   ;;  %s3248_s8 = inlined_call_operand.vmem [shape: bf16[32,32], index: 8, kind: input, shape index: {}]   ;;  %s3249_s9 = inlined_call_operand.vmem [shape: f32[1,32], index: 9, kind: input, shape index: {}]   ;;  %s3250_s10 = inlined_call_operand.vmem [shape: bf16[32,32], index: 10, kind: input, shape index: {}]   ;;  %s3251_s11 = inlined_call_operand.vmem [shape: f32[1,32], index: 11, kind: input, shape index: {}]   ;;  %s3252_s12 = inlined_call_operand.vmem [shape: f32[1,32], index: 12, kind: input, shape index: {}]   ;;  %s3253_s13 = inlined_call_operand.vmem [shape: f32[1,32], index: 13, kind: input, shape index: {}]   ;;  %s3254_s14 = inlined_call_operand.vmem [shape: f32[2,8,32], index: 14, kind: output, shape index: {0}]   ;;  %s3255_s15 = inlined_call_operand.hbm [shape: bf16[4,2,8,128], index: 15, kind: output, shape index: {1}]  }
   0x1   :  { %3261 = sst [smem:[#allocation12_spill]] %s3240_s0 }
   0x2   :  { %3262 = sst [smem:[#allocation13_spill]] %s3241_s1 }
   0x3   :  { %3263 = sst [smem:[#allocation14_spill]] %s3242_s2 }
   0x4   :  { %3264 = sst [smem:[#allocation15_spill]] %s3244_s4 }
   0x5   :  { %21 = vsyncpa [#allocation6], 0 }
   0x6   :  { %23 = vsyncpa [#allocation6 + $0x1], 0  ;;  %s2692_s18 = smov 0   ;;  %s2694_s19 = smov 0  }
   0x7   :  { %s2696_s20 = smov 0   ;;  %s2698_s21 = smov 0  }
   0x8   :  { %s2700_s22 = smov 0   ;;  %s2702_s23 = smov 0  }
   0x9 LB: > { %3265 = sst [smem:[#allocation8_spill]] %s2585_s20  ;;  %s2044_s24 = sadd.s32 4294967295, %s2597_s23   ;;  %s2597_s23 = sphi %s2702_s23, %s29_s23   ;;  %s2593_s22 = sphi %s2700_s22, %s3282_s22   ;;  %s2589_s21 = sphi %s2698_s21, %s3281_s21   ;;  %s2585_s20 = sphi %s2696_s20, %s3280_s20   ;;  %s2581_s19 = sphi %s2694_s19, %s3284_s19   ;;  %s2577_s18 = sphi %s2692_s18, %s3283_s18  }
   0xa   : > { %3266 = sst [smem:[#allocation9_spill]] %s2593_s22  ;;  %s2045_s25 = sadd.s32 4294967294, %s2597_s23  }
   0xb   : > { %s41_s26 = sadd.s32 1, %s2593_s22  ;;  %s398_s27 = sadd.s32 1, %s2585_s20 }
   0xc   : > { %p43_p0 = scmp.ge.s32.totalorder %s41_s26, 2  ;;  %p408_p1 = scmp.ne.s32.totalorder %s2585_s20, %s2581_s19 }
   0xd   : > { %p409_p2 = scmp.eq.s32.totalorder %s2044_s24, 1  ;;  %p414_p3 = scmp.ne.s32.totalorder %s2581_s19, %s2577_s18 }
   0xe   : > { %s3286_s26 = smov (%p43_p0, %s41_s26), 0  ;;  %p415_p5 = scmp.eq.s32.totalorder %s2045_s25, 1 }
   0xf   : > { %3267 = sst [smem:[#allocation10_spill]] %s3286_s26  ;;  %p2732_p4 = por %p409_p2, %p408_p1 }
  0x10   : > { %s393_s29 = ssub.s32 %s2593_s22, %s3286_s26  ;;  %p2048_p6 = scmp.ge.s32.totalorder %s2597_s23, 1 }
  0x11   : > { %p396_p7 = scmp.eq.s32.totalorder %s393_s29, 0  ;;  %p2739_p8 = por %p415_p5, %p414_p3 }
  0x12   : > { %p501_p9 = scmp.lt.s32.totalorder %s2597_s23, 3 }
  0x13   : > { %s2745_s16 = scalar_select %p396_p7, %s2585_s20, %s398_s27  }
  0x14   : > { %p502_p10 = pnand %p2048_p6, %p501_p9 }
  0x15   : > { %3270 = sst [smem:[#allocation11_spill]] %s2745_s16  ;;  %v2492_v0 = vld [vmem:[%s3246_s6] sm:$0xff] (!%p502_p10)   ;;  %p577_p11 = scmp.lt.s32.totalorder (!%p502_p10), %s2589_s21, 1  ;;  %v2493_v1 = vld [vmem:[%s3246_s6 + $0x8] sm:$0xff] (!%p502_p10)   ;;  %vm664_vm0 = vcmask (!%p502_p10), 261120   ;;  %v2599_v12 = vmov (!%p502_p10), 0.0  }
  0x16   : > { %505 = sbr.rel (%p502_p10) target bundleno = 3505 (0xdb1), region = 76  ;;  %2204 = vmatprep.subr.bf16.mxu0 (!%p502_p10), %v2492_v0  ;;  %2420 = vmatprep.subr.bf16.mxu1 (!%p502_p10), %v2492_v0  ;;  %s3271_s1 = sld [smem:[#allocation13_spill]] (!%p502_p10)  ;;  %vm2600_vm1 = vmmov (!%p502_p10), 0   ;;  %v2496_v31 = vld [vmem:[%s3248_s8] sm:$0xff] (!%p502_p10)   ;;  %v2497_v32 = vld [vmem:[%s3248_s8 + $0x8] sm:$0xff] (!%p502_p10)   ;;  %vm1025_vm2 = vcmask (!%p502_p10), 64512  }
  0x17   : > { %2205 = vmatpush3.bf16.msra.mxu0 (!%p502_p10), %v2492_v0  ;;  %2422 = vmatpush3.bf16.msra.mxu1 (!%p502_p10), %v2492_v0  ;;  %s3272_s4 = sld [smem:[#allocation15_spill]] (!%p502_p10)  ;;  %s3273_s0 = sld [smem:[#allocation12_spill]] (!%p502_p10)  ;;  %v2056_v34 = vld [vmem:[%s3247_s7] ss:$0 sm:$0xff] (!%p502_p10)  ;;  %vm1151_vm5 = vcmask (!%p502_p10), 60416   ;;  %vm1356_vm6 = vcmask (!%p502_p10), 126016  }
  0x18   : > { %2206 = vmatprep.subr.bf16.mxu0 (!%p502_p10), %v2493_v1  ;;  %2421 = vmatprep.subr.bf16.mxu1 (!%p502_p10), %v2493_v1  ;;  %s2601_s17 = smov (!%p502_p10), 120   ;;  %s3274_s2 = sld [smem:[#allocation14_spill]] (!%p502_p10)  ;;  %vm1560_vm7 = vcmask (!%p502_p10), 191616   ;;  %vm1764_vm8 = vcmask (!%p502_p10), 257216  }
  0x19   : > { %s3260_s16 = sand.u32 (!%p502_p10), 1, %s2581_s19  }
  0x1b   : > { %2207 = vmatpush3.bf16.msra.mxu0 (!%p502_p10), %v2493_v1  ;;  %2423 = vmatpush3.bf16.msra.mxu1 (!%p502_p10), %v2493_v1 }
  0x1c   : > { %2244 = vmatprep.subr.bf16.mxu0 (!%p502_p10), %v2599_v12  ;;  %2224 = vmatprep.subr.bf16.mxu1 (!%p502_p10), %v2496_v31 }
  0x1d   : > { %s2755_s29 = scalar_select %p577_p11, %s2589_s21, 1  ;;  %v2494_v2 = vld [vmem:[%s3272_s4] sm:$0xff]   ;;  %v2495_v15 = vld [vmem:[%s3272_s4 + $0x8] sm:$0xff]  }
  0x1f   : > { %s2102_s27 = sshll.u32 %s2755_s29, 7  ;;  %s3259_s26 = sshll.u32 %s2755_s29, 3 }
  0x20   : > { %s2761_s24 = scalar_lea.vmem %s3271_s1, %s2102_s27  ;;  %s2802_s27 = scalar_lea.vmem %s3273_s0, %s3259_s26 }
  0x21   : > { %v617_v3 = vld [vmem:[%s2761_s24] sm:$0xff]  ;;  %v618_v4 = vld [vmem:[%s2761_s24 + $0x8] sm:$0xff]  ;;  %v619_v5 = vld [vmem:[%s2761_s24 + $0x10] sm:$0xff]  ;;  %s2053_s25 = sshll.u32 %s2755_s29, 2 }
  0x22   : > { %v633_v6 = vpack.c.bf16 %v618_v4, %v617_v3  ;;  %v620_v7 = vld [vmem:[%s2761_s24 + $0x18] sm:$0xff]  ;;  %v621_v8 = vld [vmem:[%s2761_s24 + $0x20] sm:$0xff]  ;;  %v622_v9 = vld [vmem:[%s2761_s24 + $0x28] sm:$0xff]  ;;  %s595_s22 = scalar_lea.vmem %s3274_s2, %s2053_s25  ;;  %s3277_s2 = sand.u32 1, %s2581_s19  }
  0x23   : > { %v634_v10 = vpack.c.bf16 %v620_v7, %v619_v5  ;;  %v635_v11 = vpack.c.bf16 %v622_v9, %v621_v8  ;;  %v623_v13 = vld [vmem:[%s2761_s24 + $0x30] sm:$0xff]  ;;  %v624_v14 = vld [vmem:[%s2761_s24 + $0x38] sm:$0xff]  ;;  %v625_v16 = vld [vmem:[%s2761_s24 + $0x40] sm:$0xff]  ;;  %s3182_s4 = scalar_lea.sflag [#allocation6], %s3277_s2 }
  0x24   : > { %2208 = vmatprep.mubr.msk.bf16.mxu0 %vm664_vm0, %v633_v6  ;;  %v629_v17 = vld [vmem:[%s2761_s24 + $0x60] sm:$0xff]  ;;  %v630_v18 = vld [vmem:[%s2761_s24 + $0x68] sm:$0xff]  ;;  %v631_v19 = vld [vmem:[%s2761_s24 + $0x70] sm:$0xff]  ;;  %v636_v24 = vpack.c.bf16 %v624_v14, %v623_v13 }
  0x25   : > { %2209 = vmatmul.mubr.msk.bf16.vlgmr.msra.gmra.mrb[0].mxu0 %vm664_vm0, %v634_v10  ;;  %v626_v20 = vld [vmem:[%s2761_s24 + $0x48] sm:$0xff]  ;;  %v639_v21 = vpack.c.bf16 %v630_v18, %v629_v17  ;;  %v632_v22 = vld [vmem:[%s2761_s24 + $0x78] sm:$0xff]  ;;  %v627_v26 = vld [vmem:[%s2761_s24 + $0x50] sm:$0xff] }
  0x26   : > { %2212 = vmatprep.mubr.msk.bf16.mxu0 %vm664_vm0, %v635_v11  ;;  %2245 = vmatpush3.bf16.msra.mxu0 %v2494_v2  ;;  %v640_v23 = vpack.c.bf16 %v632_v22, %v631_v19  ;;  %v637_v25 = vpack.c.bf16 %v626_v20, %v625_v16  ;;  %v628_v27 = vld [vmem:[%s2761_s24 + $0x58] sm:$0xff]  ;;  %v938_v29 = vld [vmem:[%s2802_s27] sm:$0xff]  ;;  %s2049_s24 = sshll.u32 %s3260_s16, 4  ;;  %s2607_s16 = smov 24  }
  0x27   : > { %2246 = vmatprep.subr.bf16.mxu0 %v2599_v12  ;;  %2220 = vmatprep.mubr.msk.bf16.mxu1 %vm664_vm0, %v639_v21  ;;  %v638_v28 = vpack.c.bf16 %v628_v27, %v627_v26  ;;  %v939_v30 = vpack.c.bf16 %v938_v29, %v938_v29  ;;  %s2976_s20 = scalar_lea.vmem [#allocation5], %s2049_s24  ;;  %s2605_s24 = smov 8  }
  0x28   : > { %2221 = vmatmul.mubr.msk.bf16.vlgmr.msra.gmra.mrb[0].mxu1 %vm664_vm0, %v640_v23 }
  0x29   : > { %2228 = vmatprep.mubr.msk.bf16.mxu1 %vm664_vm0, %v633_v6  ;;  %2225 = vmatpush3.bf16.msra.mxu1 %v2496_v31 }
  0x2a   : > { %2247 = vmatpush3.bf16.msra.mxu0 %v2495_v15  ;;  %2226 = vmatprep.subr.bf16.mxu1 %v2497_v32 }
  0x2b   : > { %2272 = vmatprep.subr.bf16.mxu0 %v2599_v12 }
  0x2d   : > { %2213 = vmatmul.mubr.msk.bf16.gmra.mrb[4].mxu0 %vm664_vm0, %v636_v24  ;;  %2227 = vmatpush3.bf16.msra.mxu1 %v2497_v32 }
  0x2e   : > { %2216 = vmatprep.mubr.msk.bf16.mxu0 %vm664_vm0, %v637_v25  ;;  %2252 = vmatprep.subr.bf16.mxu1 %v2599_v12 }
  0x30   : > { %2229 = vmatmul.mubr.msk.bf16.vlgmr.msra.gmra.mrb[4].mxu1 %vm664_vm0, %v634_v10 }
  0x31   : > { %2232 = vmatprep.mubr.msk.bf16.mxu1 %vm664_vm0, %v635_v11 }
  0x35   : > { %2217 = vmatmul.mubr.msk.bf16.gmra.mrb[8].mxu0 %vm664_vm0, %v638_v28 }
  0x36   : > { %2248 = vmatprep.mubr.msk.bf16.mxu0 %vm2600_vm1, %v2599_v12 }
  0x38   : > { %2233 = vmatmul.mubr.msk.bf16.gmra.mrb[8].mxu1 %vm664_vm0, %v636_v24 }
  0x39   : > { %2236 = vmatprep.mubr.msk.bf16.mxu1 %vm664_vm0, %v637_v25  ;;  %v2078_v25 = vld [vmem:[%s3245_s5] ss:$0 sm:$0xff] }
  0x3d   : > { %2249 = vmatmul.mubr.msk.bf16.vlgmr.msra.gmra.mrb[12].mxu0 %vm664_vm0, %v939_v30 }
  0x3e   : > { %2288 = vmatprep.mubr.msk.bf16.mxu0 %vm2600_vm1, %v2599_v12 }
  0x40   : > { %2237 = vmatmul.mubr.msk.bf16.gmra.mrb[12].mxu1 %vm664_vm0, %v638_v28 }
  0x41   : > { %2240 = vmatprep.mubr.msk.bf16.mxu1 %vm664_vm0, %v639_v21 }
  0x48   : > { %2241 = vmatmul.mubr.msk.bf16.gmra.mrb[16].mxu1 %vm664_vm0, %v640_v23 }
  0x49   : > { %2268 = vmatprep.mubr.msk.bf16.mxu1 %vm2600_vm1, %v2599_v12 }
  0xf8   : > { %v2210_v33 = vpop.f32.mrb[0].mxu0 }
  0xf9   : > { %v723_v35 = vpop.f32.mrb[1].mxu0  ;;  %v732_v37 = vadd.f32 %v2210_v33, %v2056_v34 }
  0xfa   : > { %v2211_v36 = vpop.f32.mrb[2].mxu0  ;;  %v724_v40 = vadd.f32 %v2056_v34, %v723_v35 }
  0xfb   : > { %v735_v38 = vadd.f32 %v2211_v36, %v2056_v34  ;;  %v726_v39 = vpop.f32.mrb[3].mxu0  ;;  %v2222_v42 = vpop.f32.mrb[0].mxu1 }
  0xfc   : > { %v727_v41 = vadd.f32 %v2056_v34, %v726_v39  ;;  %v780_v44 = vadd.f32 %v2222_v42, %v2056_v34  ;;  %v771_v45 = vpop.f32.mrb[1].mxu1 }
  0xfd   : > { %v907_v43 = vpack.c.bf16 %v735_v38, %v732_v37  ;;  %v772_v47 = vadd.f32 %v2056_v34, %v771_v45  ;;  %v2223_v48 = vpop.f32.mrb[2].mxu1 }
  0xfe   : > { %v906_v46 = vpack.c.bf16 %v727_v41, %v724_v40  ;;  %v783_v49 = vadd.f32 %v2223_v48, %v2056_v34  ;;  %v774_v50 = vpop.f32.mrb[3].mxu1 }
  0xff   : > { %915 = vst.msk [vmem:[#allocation2 + $0x8] sm:$0xff] %vm664_vm0, %v907_v43  ;;  %v775_v52 = vadd.f32 %v2056_v34, %v774_v50 }
 0x100   : > { %914 = vst.msk [vmem:[#allocation2] sm:$0xff] %vm664_vm0, %v906_v46  ;;  %v2214_v51 = vpop.f32.mrb[4].mxu0  ;;  %v913_v55 = vpack.c.bf16 %v783_v49, %v780_v44 }
 0x101   : > { %v748_v53 = vadd.f32 %v2214_v51, %v2056_v34  ;;  %v739_v54 = vpop.f32.mrb[5].mxu0  ;;  %v912_v58 = vpack.c.bf16 %v775_v52, %v772_v47 }
 0x102   : > { %v740_v56 = vadd.f32 %v2056_v34, %v739_v54  ;;  %v2215_v57 = vpop.f32.mrb[6].mxu0  ;;  %921 = vst.msk [vmem:[#allocation2 + $0x38] sm:$0xff] %vm664_vm0, %v913_v55 }
 0x103   : > { %v751_v59 = vadd.f32 %v2215_v57, %v2056_v34  ;;  %v742_v60 = vpop.f32.mrb[7].mxu0  ;;  %920 = vst.msk [vmem:[#allocation2 + $0x30] sm:$0xff] %vm664_vm0, %v912_v58  ;;  %v2230_v35 = vpop.f32.mrb[4].mxu1 }
 0x104   : > { %v743_v61 = vadd.f32 %v2056_v34, %v742_v60  ;;  %v843_v37 = vpop.f32.mrb[5].mxu1 }
 0x105   : > { %v909_v62 = vpack.c.bf16 %v751_v59, %v748_v53  ;;  %v2231_v39 = vpop.f32.mrb[6].mxu1 }
 0x106   : > { %v908_v63 = vpack.c.bf16 %v743_v61, %v740_v56  ;;  %v2843_v7 = vld [vmem:[#allocation2 + $0x8] sm:$0xff]  ;;  %v846_v41 = vpop.f32.mrb[7].mxu1 }
 0x107   : > { %917 = vst.msk [vmem:[#allocation2 + $0x18] sm:$0xff] %vm664_vm0, %v909_v62  ;;  %v2835_v0 = vld [vmem:[#allocation2] sm:$0xff]  ;;  %v1033_v15 = vsel %vm1025_vm2, %v2843_v7, 0 }
 0x108   : > { %916 = vst.msk [vmem:[#allocation2 + $0x10] sm:$0xff] %vm664_vm0, %v908_v63  ;;  %1180 = vrot.lane.b32.xlu1 %v2835_v0, %s2601_s17  ;;  %v1030_v1 = vsel %vm1025_vm2, %v2835_v0, 0  ;;  %v2218_v2 = vpop.f32.mrb[8].mxu0 }
 0x109   : > { %2253 = vmatpush3.bf16.xpose.msra.mxu1 %v1030_v1  ;;  %v764_v3 = vadd.f32 %v2218_v2, %v2056_v34  ;;  %v755_v4 = vpop.f32.mrb[9].mxu0  ;;  %v2878_v28 = vld [vmem:[#allocation2 + $0x38] sm:$0xff] }
 0x10a   : > { %2254 = vmatprep.subr.bf16.mxu1 %v2599_v12  ;;  %v756_v5 = vadd.f32 %v2056_v34, %v755_v4  ;;  %v2219_v6 = vpop.f32.mrb[10].mxu0  ;;  %v2869_v24 = vld [vmem:[#allocation2 + $0x30] sm:$0xff]  ;;  %v1051_v33 = vsel %vm1025_vm2, %v2878_v28, 0 }
 0x10b   : > { %v767_v8 = vadd.f32 %v2219_v6, %v2056_v34  ;;  %v758_v9 = vpop.f32.mrb[11].mxu0  ;;  %v1048_v32 = vsel %vm1025_vm2, %v2869_v24, 0  ;;  %v2234_v45 = vpop.f32.mrb[8].mxu1 }
 0x10c   : > { %1182 = vrot.lane.b32.xlu1 %v2843_v7, %s2601_s17  ;;  %v759_v10 = vadd.f32 %v2056_v34, %v758_v9  ;;  %v2067_v34 = vld [vmem:[%s3249_s9] ss:$0 sm:$0xff]  ;;  %v859_v47 = vpop.f32.mrb[9].mxu1 }
 0x10d   : > { %v911_v11 = vpack.c.bf16 %v767_v8, %v764_v3  ;;  %v852_v36 = vadd.f32 %v2230_v35, %v2067_v34  ;;  %v844_v38 = vadd.f32 %v2067_v34, %v843_v37  ;;  %v855_v40 = vadd.f32 %v2231_v39, %v2067_v34  ;;  %v2235_v49 = vpop.f32.mrb[10].mxu1 }
 0x10e   : > { %v910_v13 = vpack.c.bf16 %v759_v10, %v756_v5  ;;  %v2847_v14 = vld [vmem:[#allocation2 + $0x18] sm:$0xff]  ;;  %v847_v42 = vadd.f32 %v2067_v34, %v846_v41  ;;  %v868_v46 = vadd.f32 %v2234_v45, %v2067_v34  ;;  %v860_v48 = vadd.f32 %v2067_v34, %v859_v47  ;;  %v862_v51 = vpop.f32.mrb[11].mxu1 }
 0x10f   : > { %919 = vst.msk [vmem:[#allocation2 + $0x28] sm:$0xff] %vm664_vm0, %v911_v11  ;;  %v2856_v20 = vld [vmem:[#allocation2 + $0x10] sm:$0xff]  ;;  %v1039_v26 = vsel %vm1025_vm2, %v2847_v14, 0  ;;  %v923_v43 = vpack.c.bf16 %v855_v40, %v852_v36  ;;  %v871_v50 = vadd.f32 %v2235_v49, %v2067_v34  ;;  %v863_v52 = vadd.f32 %v2067_v34, %v862_v51  ;;  %v1008_v40 = vld [vmem:[%s595_s22] sm:$0xf]  ;;  %s2603_s22 = smov 112  }
 0x110   : > { %918 = vst.msk [vmem:[#allocation2 + $0x20] sm:$0xff] %vm664_vm0, %v910_v13  ;;  %1186 = vrot.lane.b32.xlu1 %v2847_v14, %s2601_s17  ;;  %v1001_v16 = vpop.f32.mrb[12].mxu0  ;;  %v1036_v22 = vsel %vm1025_vm2, %v2856_v20, 0  ;;  %v922_v44 = vpack.c.bf16 %v847_v42, %v844_v38  ;;  %vm1094_vm3 = vcmp.gt.bf16.partialorder %v1008_v40, 0 }
 0x111   : > { %2255 = vmatpush3.bf16.xpose.msra.mxu1 %v1033_v15  ;;  %v2250_v17 = vpop.f32.mrb[13].mxu0  ;;  %v1002_v27 = vadd.f32 %v2078_v25, %v1001_v16  ;;  %931 = vst.msk [vmem:[#allocation3 + $0x8] sm:$0xff] %vm664_vm0, %v923_v43  ;;  %v925_v53 = vpack.c.bf16 %v871_v50, %v868_v46  ;;  %v924_v54 = vpack.c.bf16 %v863_v52, %v860_v48  ;;  %v2602_v25 = vmov 0  }
 0x112   : > { %2256 = vmatprep.subr.bf16.mxu1 %v2599_v12  ;;  %v1004_v18 = vpop.f32.mrb[14].mxu0  ;;  %930 = vst.msk [vmem:[#allocation3] sm:$0xff] %vm664_vm0, %v922_v44  ;;  %2491 = vset.pattern.permute.xlu0 %v2602_v25  ;;  %v1095_v41 = vsel %vm1094_vm3, 65537, %v2602_v25 }
 0x113   : > { %v2251_v19 = vpop.f32.mrb[15].mxu0  ;;  %v2883_v29 = vpack.c.bf16 %v1002_v27, %v1002_v27  ;;  %933 = vst.msk [vmem:[#allocation3 + $0x18] sm:$0xff] %vm664_vm0, %v925_v53  ;;  %932 = vst.msk [vmem:[#allocation3 + $0x10] sm:$0xff] %vm664_vm0, %v924_v54  ;;  %v2238_v56 = vpop.f32.mrb[12].mxu1  ;;  %v1096_v42 = vunpack.c.l.b16 %v1095_v41 }
 0x114   : > { %v884_v58 = vadd.f32 %v2238_v56, %v2067_v34  ;;  %v875_v59 = vpop.f32.mrb[13].mxu1 }
 0x115   : > { %v876_v60 = vadd.f32 %v2067_v34, %v875_v59  ;;  %v2239_v61 = vpop.f32.mrb[14].mxu1  ;;  %vm2964_vm4 = vcmp.ne.s32.totalorder %v1096_v42, 0 }
 0x116   : > { %v2864_v23 = vld [vmem:[#allocation2 + $0x28] sm:$0xff]  ;;  %v887_v62 = vadd.f32 %v2239_v61, %v2067_v34  ;;  %v878_v63 = vpop.f32.mrb[15].mxu1 }
 0x117   : > { %v2858_v21 = vld [vmem:[#allocation2 + $0x20] sm:$0xff]  ;;  %v1045_v31 = vsel %vm1025_vm2, %v2864_v23, 0  ;;  %v879_v1 = vadd.f32 %v2067_v34, %v878_v63 }
 0x118   : > { %1188 = vrot.lane.b32.xlu1 %v2858_v21, %s2601_s17  ;;  %v1042_v30 = vsel %vm1025_vm2, %v2858_v21, 0  ;;  %v2916_v57 = vld [vmem:[#allocation3 + $0x8] sm:$0xff]  ;;  %v927_v2 = vpack.c.bf16 %v887_v62, %v884_v58 }
 0x119   : > { %2257 = vmatpush3.bf16.xpose.msra.mxu1 %v1036_v22  ;;  %v2908_v55 = vld [vmem:[#allocation3] sm:$0xff]  ;;  %v926_v3 = vpack.c.bf16 %v879_v1, %v876_v60 }
 0x11a   : > { %2258 = vmatprep.subr.bf16.mxu1 %v2599_v12  ;;  %2273 = vmatpush3.bf16.msra.mxu0 %v2908_v55  ;;  %v2922_v4 = vld [vmem:[#allocation3 + $0x18] sm:$0xff]  ;;  %935 = vst.msk [vmem:[#allocation3 + $0x28] sm:$0xff] %vm664_vm0, %v927_v2  ;;  %v2925_v5 = vld [vmem:[#allocation3 + $0x10] sm:$0xff] }
 0x11b   : > { %2274 = vmatprep.subr.bf16.mxu0 %v2599_v12  ;;  %934 = vst.msk [vmem:[#allocation3 + $0x20] sm:$0xff] %vm664_vm0, %v926_v3  ;;  %v2242_v6 = vpop.f32.mrb[16].mxu1 }
 0x11c   : > { %1190 = vrot.lane.b32.xlu1 %v2864_v23, %s2601_s17  ;;  %v900_v8 = vadd.f32 %v2242_v6, %v2067_v34  ;;  %v891_v9 = vpop.f32.mrb[17].mxu1 }
 0x11d   : > { %v892_v10 = vadd.f32 %v2067_v34, %v891_v9  ;;  %v2243_v11 = vpop.f32.mrb[18].mxu1 }
 0x11e   : > { %2275 = vmatpush3.bf16.msra.mxu0 %v2916_v57  ;;  %v903_v13 = vadd.f32 %v2243_v11, %v2067_v34  ;;  %v894_v15 = vpop.f32.mrb[19].mxu1 }
 0x11f   : > { %2276 = vmatprep.subr.bf16.mxu0 %v2599_v12  ;;  %v895_v16 = vadd.f32 %v2067_v34, %v894_v15 }
 0x120   : > { %1192 = vrot.lane.b32.xlu1 %v2869_v24, %s2601_s17  ;;  %v929_v17 = vpack.c.bf16 %v903_v13, %v900_v8 }
 0x121   : > { %2259 = vmatpush3.bf16.xpose.msra.mxu1 %v1039_v26  ;;  %v928_v18 = vpack.c.bf16 %v895_v16, %v892_v10  ;;  %v2940_v22 = vld [vmem:[#allocation3 + $0x28] sm:$0xff] }
 0x122   : > { %2260 = vmatprep.subr.bf16.mxu1 %v2599_v12  ;;  %2277 = vmatpush3.bf16.msra.mxu0 %v2925_v5  ;;  %937 = vst.msk [vmem:[#allocation3 + $0x38] sm:$0xff] %vm664_vm0, %v929_v17  ;;  %v2935_v19 = vld [vmem:[#allocation3 + $0x20] sm:$0xff] }
 0x123   : > { %2278 = vmatprep.subr.bf16.mxu0 %v2599_v12  ;;  %936 = vst.msk [vmem:[#allocation3 + $0x30] sm:$0xff] %vm664_vm0, %v928_v18 }
 0x124   : > { %1194 = vrot.lane.b32.xlu1 %v2878_v28, %s2601_s17 }
 0x126   : > { %2279 = vmatpush3.bf16.msra.mxu0 %v2922_v4 }
 0x127   : > { %2280 = vmatprep.subr.bf16.mxu0 %v2599_v12 }
 0x128   : > { %1170 = vrot.lane.b32.xlu1 %v2883_v29, %s2601_s17 }
 0x129   : > { %2261 = vmatpush3.bf16.xpose.msra.mxu1 %v1042_v30  ;;  %v2948_v27 = vld [vmem:[#allocation3 + $0x38] sm:$0xff] }
 0x12a   : > { %2262 = vmatprep.subr.bf16.mxu1 %v2599_v12  ;;  %2281 = vmatpush3.bf16.msra.mxu0 %v2935_v19  ;;  %v2944_v26 = vld [vmem:[#allocation3 + $0x30] sm:$0xff] }
 0x12b   : > { %2282 = vmatprep.subr.bf16.mxu0 %v2599_v12 }
 0x12c   : > { %1285 = vrot.lane.b32.xlu1 %v2908_v55, %s2601_s17 }
 0x12e   : > { %2283 = vmatpush3.bf16.msra.mxu0 %v2940_v22 }
 0x12f   : > { %2284 = vmatprep.subr.bf16.mxu0 %v2599_v12 }
 0x130   : > { %1287 = vrot.lane.b32.xlu1 %v2916_v57, %s2601_s17 }
 0x131   : > { %2263 = vmatpush3.bf16.xpose.msra.mxu1 %v1045_v31 }
 0x132   : > { %2264 = vmatprep.subr.bf16.mxu1 %v2599_v12  ;;  %2285 = vmatpush3.bf16.msra.mxu0 %v2944_v26 }
 0x133   : > { %2286 = vmatprep.subr.bf16.mxu0 %v2599_v12 }
 0x134   : > { %1291 = vrot.lane.b32.xlu1 %v2922_v4, %s2601_s17 }
 0x136   : > { %2287 = vmatpush3.bf16.msra.mxu0 %v2948_v27 }
 0x137   : > { %2292 = vmatprep.subr.bf16.mxu0 %v2599_v12 }
 0x138   : > { %1299 = vrot.lane.b32.xlu1 %v2948_v27, %s2601_s17 }
 0x139   : > { %2265 = vmatpush3.bf16.xpose.msra.mxu1 %v1048_v32 }
 0x13a   : > { %2266 = vmatprep.subr.bf16.mxu1 %v2599_v12 }
 0x141   : > { %2267 = vmatpush3.bf16.xpose.msra.mxu1 %v1051_v33 }
 0x142   : > { %2312 = vmatprep.subr.bf16.mxu1 %v2599_v12 }
 0x148   : > { %2269 = vmatmul.mubr.msk.bf16.vlgmr.msra.gmra.mrb[20].mxu1 %vm1025_vm2, %v2883_v29 }
 0x149   : > { %2328 = vmatprep.mubr.msk.bf16.mxu1 %vm2600_vm1, %v2599_v12 }
 0x17a   : > { %v1181_v30 = vpop.permute.xlu1 %1180 }
 0x17b   : > { %v1200_v60 = vsel %vm1025_vm2, %v1181_v30, 0 }
 0x17e   : > { %v1183_v31 = vpop.permute.xlu1 %1182 }
 0x17f   : > { %v1203_v61 = vsel %vm1025_vm2, %v1183_v31, 0 }
 0x182   : > { %v1187_v32 = vpop.permute.xlu1 %1186 }
 0x183   : > { %v1209_v1 = vsel %vm1025_vm2, %v1187_v32, 0 }
 0x18a   : > { %v1189_v33 = vpop.permute.xlu1 %1188 }
 0x18b   : > { %v1212_v2 = vsel %vm1025_vm2, %v1189_v33, 0 }
 0x18e   : > { %v1191_v34 = vpop.permute.xlu1 %1190 }
 0x18f   : > { %v1215_v3 = vsel %vm1025_vm2, %v1191_v34, 0 }
 0x192   : > { %v1193_v35 = vpop.permute.xlu1 %1192 }
 0x193   : > { %v1218_v6 = vsel %vm1025_vm2, %v1193_v35, 0 }
 0x196   : > { %v1195_v36 = vpop.permute.xlu1 %1194 }
 0x197   : > { %v1221_v8 = vsel %vm1025_vm2, %v1195_v36, 0 }
 0x19a   : > { %v2954_v37 = vpop.permute.xlu1 %1170 }
 0x19e   : > { %v1286_v38 = vpop.permute.xlu1 %1285 }
 0x19f   : > { %2313 = vmatpush3.bf16.msra.mxu1 %v1286_v38 }
 0x1a0   : > { %2314 = vmatprep.subr.bf16.mxu1 %v2599_v12 }
 0x1a2   : > { %v1288_v39 = vpop.permute.xlu1 %1287 }
 0x1a3   : > { %2315 = vmatpush3.bf16.msra.mxu1 %v1288_v39 }
 0x1a4   : > { %2316 = vmatprep.subr.bf16.mxu1 %v2599_v12 }
 0x1a6   : > { %v1292_v36 = vpop.permute.xlu1 %1291 }
 0x1aa   : > { %v1300_v42 = vpop.permute.xlu1 %1299 }
 0x21b   : > { %v1087_v43 = vpop.f32.mrb[20].mxu1 }
 0x21c   : > { %v1093_v45 = vmul.f32 0.35355338, %v1087_v43  ;;  %v2270_v46 = vpop.f32.mrb[21].mxu1 }
 0x21d   : > { %v1090_v47 = vpop.f32.mrb[22].mxu1 }
 0x21e   : > { %v2271_v48 = vpop.f32.mrb[23].mxu1  ;;  %v1098_v49 = vsel %vm2964_vm4, -1e+30, %v1093_v45 }
 0x21f   : > { %1099 = vmax.xlane.f32.xlu0 %v1098_v49 }
 0x2ac   : > { %v1100_v50 = vpop.xlane.xlu0 %1099 }
 0x2ad   : > { %v1101_v51 = vsub.f32 %v1098_v49, %v1100_v50 }
 0x2af   : > { %v1102_v52 = vmul.f32 1.442695, %v1101_v51 }
 0x2b1   : > { %2500 = vpow2.f32 %v1102_v52 }
 0x2bb   : > { %v2501_v53 = vpop.eup %2500 }
 0x2bc   : > { %1104 = vadd.xlane.f32.xlu0 %v2501_v53 }
 0x2d2   : > { %1184 = vrot.lane.b32.xlu0 %v2856_v20, %s2601_s17 }
 0x349   : > { %v1105_v54 = vpop.xlane.xlu0 %1104 }
 0x34a   : > { %2502 = vrcp.f32 %v1105_v54 }
 0x34d   : > { %v1185_v62 = vpop.permute.xlu0 %1184 }
 0x34e   : > { %v1206_v63 = vsel %vm1025_vm2, %v1185_v62, 0 }
 0x354   : > { %v2503_v56 = vpop.eup %2502 }
 0x355   : > { %v1107_v58 = vmul.f32 %v2503_v56, %v2501_v53 }
 0x357   : > { %v1108_v59 = vpack.c.bf16 %v1107_v58, %v1107_v58 }
 0x359   : > { %1109 = vst [vmem:[%s2976_s20] sm:$0xf] %v1108_v59  ;;  %2289 = vmatmul.mubr.bf16.vlgmr.msra.gmra.mrb[16].mxu0 %v1108_v59 }
 0x35a   : > { %2293 = vmatpush3.bf16.xpose.msra.mxu0 %v1200_v60  ;;  %2308 = vmatprep.mubr.msk.bf16.mxu0 %vm2600_vm1, %v2599_v12 }
 0x35b   : > { %2294 = vmatprep.subr.bf16.mxu0 %v2599_v12 }
 0x362   : > { %2295 = vmatpush3.bf16.xpose.msra.mxu0 %v1203_v61 }
 0x363   : > { %2296 = vmatprep.subr.bf16.mxu0 %v2599_v12 }
 0x36a   : > { %2297 = vmatpush3.bf16.xpose.msra.mxu0 %v1206_v63 }
 0x36b   : > { %2298 = vmatprep.subr.bf16.mxu0 %v2599_v12 }
 0x372   : > { %2299 = vmatpush3.bf16.xpose.msra.mxu0 %v1209_v1 }
 0x373   : > { %2300 = vmatprep.subr.bf16.mxu0 %v2599_v12 }
 0x37a   : > { %2301 = vmatpush3.bf16.xpose.msra.mxu0 %v1212_v2 }
 0x37b   : > { %2302 = vmatprep.subr.bf16.mxu0 %v2599_v12 }
 0x382   : > { %2303 = vmatpush3.bf16.xpose.msra.mxu0 %v1215_v3 }
 0x383   : > { %2304 = vmatprep.subr.bf16.mxu0 %v2599_v12 }
 0x38a   : > { %2305 = vmatpush3.bf16.xpose.msra.mxu0 %v1218_v6 }
 0x38b   : > { %2306 = vmatprep.subr.bf16.mxu0 %v2599_v12 }
 0x392   : > { %2307 = vmatpush3.bf16.xpose.msra.mxu0 %v1221_v8 }
 0x393   : > { %2352 = vmatprep.subr.bf16.mxu0 %v2599_v12 }
 0x399   : > { %2309 = vmatmul.mubr.msk.bf16.vlgmr.msra.gmra.mrb[20].mxu0 %vm1025_vm2, %v2954_v37 }
 0x39a   : > { %2368 = vmatprep.mubr.msk.bf16.mxu0 %vm2600_vm1, %v2599_v12 }
 0x42c   : > { %v1144_v9 = vpop.f32.mrb[16].mxu0 }
 0x42d   : > { %v1150_v10 = vpack.c.bf16 %v1144_v9, %v1144_v9  ;;  %v2290_v11 = vpop.f32.mrb[17].mxu0 }
 0x42e   : > { %v1147_v13 = vpop.f32.mrb[18].mxu0 }
 0x42f   : > { %1152 = vst.msk [vmem:[#allocation4] sm:$0xf] %vm1151_vm5, %v1150_v10  ;;  %v2291_v15 = vpop.f32.mrb[19].mxu0 }
 0x46c   : > { %v1257_v16 = vpop.f32.mrb[20].mxu0 }
 0x46d   : > { %v1263_v17 = vmul.f32 0.35355338, %v1257_v16  ;;  %v2310_v18 = vpop.f32.mrb[21].mxu0 }
 0x46e   : > { %v1260_v25 = vpop.f32.mrb[22].mxu0 }
 0x46f   : > { %v2311_v30 = vpop.f32.mrb[23].mxu0  ;;  %v1264_v31 = vsel %vm2964_vm4, -1e+30, %v1263_v17 }
 0x470   : > { %1265 = vmax.xlane.f32.xlu0 %v1264_v31 }
 0x486   : > { %1289 = vrot.lane.b32.xlu0 %v2925_v5, %s2601_s17 }
 0x48a   : > { %1293 = vrot.lane.b32.xlu0 %v2935_v19, %s2601_s17 }
 0x48e   : > { %1295 = vrot.lane.b32.xlu0 %v2940_v22, %s2601_s17 }
 0x492   : > { %1297 = vrot.lane.b32.xlu0 %v2944_v26, %s2601_s17  ;;  %s2604_s17 = smov 104  }
 0x496   : > { %1384 = vrot.lane.b32.xlu0 %v2835_v0, %s2603_s22 }
 0x49a   : > { %1388 = vrot.lane.b32.xlu0 %v2856_v20, %s2603_s22 }
 0x49e   : > { %1392 = vrot.lane.b32.xlu0 %v2858_v21, %s2603_s22 }
 0x4a2   : > { %1396 = vrot.lane.b32.xlu0 %v2869_v24, %s2603_s22 }
 0x4a6   : > { %1374 = vrot.lane.b32.xlu0 %v2883_v29, %s2603_s22 }
 0x4aa   : > { %1489 = vrot.lane.b32.xlu0 %v2908_v55, %s2603_s22 }
 0x4ae   : > { %1491 = vrot.lane.b32.xlu0 %v2916_v57, %s2603_s22 }
 0x4b2   : > { %1495 = vrot.lane.b32.xlu0 %v2922_v4, %s2603_s22 }
 0x4fd   : > { %v1266_v32 = vpop.xlane.xlu0 %1265 }
 0x4fe   : > { %v1267_v33 = vsub.f32 %v1264_v31, %v1266_v32 }
 0x500   : > { %v1268_v34 = vmul.f32 1.442695, %v1267_v33 }
 0x501   : > { %v1290_v35 = vpop.permute.xlu0 %1289 }
 0x502   : > { %2504 = vpow2.f32 %v1268_v34  ;;  %2317 = vmatpush3.bf16.msra.mxu1 %v1290_v35 }
 0x503   : > { %2318 = vmatprep.subr.bf16.mxu1 %v2599_v12 }
 0x505   : > { %v1294_v37 = vpop.permute.xlu0 %1293 }
 0x506   : > { %2319 = vmatpush3.bf16.msra.mxu1 %v1292_v36 }
 0x507   : > { %2320 = vmatprep.subr.bf16.mxu1 %v2599_v12 }
 0x509   : > { %v1296_v38 = vpop.permute.xlu0 %1295 }
 0x50a   : > { %2321 = vmatpush3.bf16.msra.mxu1 %v1294_v37 }
 0x50b   : > { %2322 = vmatprep.subr.bf16.mxu1 %v2599_v12 }
 0x50c   : > { %v2505_v39 = vpop.eup %2504 }
 0x50d   : > { %1270 = vadd.xlane.f32.xlu1 %v2505_v39  ;;  %v1298_v40 = vpop.permute.xlu0 %1297 }
 0x50e   : > { %2323 = vmatpush3.bf16.msra.mxu1 %v1296_v38 }
 0x50f   : > { %2324 = vmatprep.subr.bf16.mxu1 %v2599_v12 }
 0x511   : > { %v1385_v41 = vpop.permute.xlu0 %1384 }
 0x512   : > { %2325 = vmatpush3.bf16.msra.mxu1 %v1298_v40  ;;  %v1404_v54 = vsel %vm1025_vm2, %v1385_v41, 0 }
 0x513   : > { %2326 = vmatprep.subr.bf16.mxu1 %v2599_v12 }
 0x515   : > { %v1389_v43 = vpop.permute.xlu0 %1388 }
 0x516   : > { %2327 = vmatpush3.bf16.msra.mxu1 %v1300_v42  ;;  %v1410_v59 = vsel %vm1025_vm2, %v1389_v43, 0 }
 0x517   : > { %2332 = vmatprep.subr.bf16.mxu1 %v2599_v12 }
 0x519   : > { %v1393_v45 = vpop.permute.xlu0 %1392 }
 0x51a   : > { %v1416_v62 = vsel %vm1025_vm2, %v1393_v45, 0 }
 0x51d   : > { %v1397_v46 = vpop.permute.xlu0 %1396 }
 0x51e   : > { %1386 = vrot.lane.b32.xlu1 %v2843_v7, %s2603_s22  ;;  %v1422_v2 = vsel %vm1025_vm2, %v1397_v46, 0 }
 0x521   : > { %v1375_v47 = vpop.permute.xlu0 %1374 }
 0x522   : > { %1390 = vrot.lane.b32.xlu1 %v2847_v14, %s2603_s22 }
 0x525   : > { %v1490_v48 = vpop.permute.xlu0 %1489 }
 0x526   : > { %1394 = vrot.lane.b32.xlu1 %v2864_v23, %s2603_s22  ;;  %2353 = vmatpush3.bf16.msra.mxu0 %v1490_v48 }
 0x527   : > { %2354 = vmatprep.subr.bf16.mxu0 %v2599_v12 }
 0x529   : > { %v1492_v49 = vpop.permute.xlu0 %1491 }
 0x52a   : > { %1398 = vrot.lane.b32.xlu1 %v2878_v28, %s2603_s22  ;;  %2355 = vmatpush3.bf16.msra.mxu0 %v1492_v49 }
 0x52b   : > { %2356 = vmatprep.subr.bf16.mxu0 %v2599_v12 }
 0x59a   : > { %v1271_v50 = vpop.xlane.xlu1 %1270 }
 0x59b   : > { %2506 = vrcp.f32 %v1271_v50 }
 0x59e   : > { %v1387_v56 = vpop.permute.xlu1 %1386 }
 0x59f   : > { %v1407_v58 = vsel %vm1025_vm2, %v1387_v56, 0 }
 0x5a2   : > { %v1391_v60 = vpop.permute.xlu1 %1390 }
 0x5a3   : > { %v1413_v61 = vsel %vm1025_vm2, %v1391_v60, 0 }
 0x5a5   : > { %v2507_v51 = vpop.eup %2506 }
 0x5a6   : > { %v1273_v52 = vmul.f32 %v2507_v51, %v2505_v39  ;;  %v1395_v63 = vpop.permute.xlu1 %1394 }
 0x5a7   : > { %v1419_v1 = vsel %vm1025_vm2, %v1395_v63, 0 }
 0x5a8   : > { %v1274_v53 = vpack.c.bf16 %v1273_v52, %v1273_v52 }
 0x5aa   : > { %2084 = vst [vmem:[%s2976_s20 + $0x4] sm:$0xf] %v1274_v53  ;;  %2329 = vmatmul.mubr.bf16.vlgmr.msra.gmra.mrb[24].mxu1 %v1274_v53  ;;  %v1399_v3 = vpop.permute.xlu1 %1398 }
 0x5ab   : > { %2333 = vmatpush3.bf16.xpose.msra.mxu1 %v1404_v54  ;;  %2348 = vmatprep.mubr.msk.bf16.mxu1 %vm2600_vm1, %v2599_v12  ;;  %v1425_v6 = vsel %vm1025_vm2, %v1399_v3, 0 }
 0x5ac   : > { %2334 = vmatprep.subr.bf16.mxu1 %v2599_v12 }
 0x5b3   : > { %2335 = vmatpush3.bf16.xpose.msra.mxu1 %v1407_v58 }
 0x5b4   : > { %2336 = vmatprep.subr.bf16.mxu1 %v2599_v12 }
 0x5bb   : > { %2337 = vmatpush3.bf16.xpose.msra.mxu1 %v1410_v59 }
 0x5bc   : > { %2338 = vmatprep.subr.bf16.mxu1 %v2599_v12 }
 0x5c3   : > { %2339 = vmatpush3.bf16.xpose.msra.mxu1 %v1413_v61 }
 0x5c4   : > { %2340 = vmatprep.subr.bf16.mxu1 %v2599_v12 }
 0x5cb   : > { %2341 = vmatpush3.bf16.xpose.msra.mxu1 %v1416_v62 }
 0x5cc   : > { %2342 = vmatprep.subr.bf16.mxu1 %v2599_v12 }
 0x5d3   : > { %2343 = vmatpush3.bf16.xpose.msra.mxu1 %v1419_v1 }
 0x5d4   : > { %2344 = vmatprep.subr.bf16.mxu1 %v2599_v12 }
 0x5db   : > { %2345 = vmatpush3.bf16.xpose.msra.mxu1 %v1422_v2 }
 0x5dc   : > { %2346 = vmatprep.subr.bf16.mxu1 %v2599_v12 }
 0x5e3   : > { %2347 = vmatpush3.bf16.xpose.msra.mxu1 %v1425_v6 }
 0x5e4   : > { %2392 = vmatprep.subr.bf16.mxu1 %v2599_v12 }
 0x5ea   : > { %2349 = vmatmul.mubr.msk.bf16.vlgmr.msra.gmra.mrb[28].mxu1 %vm1025_vm2, %v1375_v47 }
 0x5eb   : > { %2408 = vmatprep.mubr.msk.bf16.mxu1 %vm2600_vm1, %v2599_v12 }
 0x67d   : > { %v3064_v8 = vpop.f32.mrb[24].mxu1 }
 0x67e   : > { %v2330_v9 = vpop.f32.mrb[25].mxu1  ;;  %v2103_v63 = vpack.c.bf16 %v3064_v8, %v3064_v8 }
 0x67f   : > { %v1346_v10 = vpop.f32.mrb[26].mxu1 }
 0x680   : > { %v2331_v11 = vpop.f32.mrb[27].mxu1 }
 0x6bd   : > { %v1461_v13 = vpop.f32.mrb[28].mxu1 }
 0x6be   : > { %v1467_v15 = vmul.f32 0.35355338, %v1461_v13  ;;  %v2350_v16 = vpop.f32.mrb[29].mxu1 }
 0x6bf   : > { %v1464_v17 = vpop.f32.mrb[30].mxu1 }
 0x6c0   : > { %v2351_v18 = vpop.f32.mrb[31].mxu1  ;;  %v1468_v25 = vsel %vm2964_vm4, -1e+30, %v1467_v15 }
 0x6c1   : > { %1469 = vmax.xlane.f32.xlu1 %v1468_v25 }
 0x6d2   : > { %1493 = vrot.lane.b32.xlu1 %v2925_v5, %s2603_s22 }
 0x6d6   : > { %1497 = vrot.lane.b32.xlu1 %v2935_v19, %s2603_s22 }
 0x6da   : > { %1499 = vrot.lane.b32.xlu1 %v2940_v22, %s2603_s22 }
 0x6de   : > { %1501 = vrot.lane.b32.xlu1 %v2944_v26, %s2603_s22 }
 0x6e2   : > { %1588 = vrot.lane.b32.xlu1 %v2835_v0, %s2604_s17 }
 0x6e6   : > { %1592 = vrot.lane.b32.xlu1 %v2856_v20, %s2604_s17 }
 0x6ea   : > { %1596 = vrot.lane.b32.xlu1 %v2858_v21, %s2604_s17  ;;  %v1496_v21 = vpop.permute.xlu0 %1495 }
 0x6ee   : > { %1600 = vrot.lane.b32.xlu1 %v2869_v24, %s2604_s17 }
 0x6f2   : > { %1578 = vrot.lane.b32.xlu1 %v2883_v29, %s2604_s17 }
 0x6f6   : > { %1693 = vrot.lane.b32.xlu1 %v2908_v55, %s2604_s17 }
 0x6fa   : > { %1697 = vrot.lane.b32.xlu1 %v2925_v5, %s2604_s17 }
 0x6fe   : > { %1703 = vrot.lane.b32.xlu1 %v2940_v22, %s2604_s17 }
 0x74e   : > { %v1470_v0 = vpop.xlane.xlu1 %1469 }
 0x74f   : > { %v1471_v20 = vsub.f32 %v1468_v25, %v1470_v0  ;;  %v2499_v25 = vld [vmem:[%s3250_s10 + $0x8] sm:$0xff]  }
 0x751   : > { %v1472_v30 = vmul.f32 1.442695, %v1471_v20 }
 0x752   : > { %v1494_v31 = vpop.permute.xlu1 %1493 }
 0x753   : > { %2508 = vpow2.f32 %v1472_v30  ;;  %2357 = vmatpush3.bf16.msra.mxu0 %v1494_v31 }
 0x754   : > { %2358 = vmatprep.subr.bf16.mxu0 %v2599_v12 }
 0x756   : > { %v1498_v24 = vpop.permute.xlu1 %1497 }
 0x757   : > { %2359 = vmatpush3.bf16.msra.mxu0 %v1496_v21 }
 0x758   : > { %2360 = vmatprep.subr.bf16.mxu0 %v2599_v12 }
 0x75a   : > { %v1500_v29 = vpop.permute.xlu1 %1499 }
 0x75b   : > { %2361 = vmatpush3.bf16.msra.mxu0 %v1498_v24 }
 0x75c   : > { %2362 = vmatprep.subr.bf16.mxu0 %v2599_v12 }
 0x75d   : > { %v2509_v55 = vpop.eup %2508 }
 0x75e   : > { %1474 = vadd.xlane.f32.xlu0 %v2509_v55  ;;  %v1502_v5 = vpop.permute.xlu1 %1501 }
 0x75f   : > { %2363 = vmatpush3.bf16.msra.mxu0 %v1500_v29 }
 0x760   : > { %2364 = vmatprep.subr.bf16.mxu0 %v2599_v12 }
 0x762   : > { %v1589_v22 = vpop.permute.xlu1 %1588 }
 0x763   : > { %2365 = vmatpush3.bf16.msra.mxu0 %v1502_v5  ;;  %v1608_v41 = vsel %vm1025_vm2, %v1589_v22, 0 }
 0x764   : > { %2366 = vmatprep.subr.bf16.mxu0 %v2599_v12 }
 0x766   : > { %v1593_v32 = vpop.permute.xlu1 %1592 }
 0x76a   : > { %v1597_v33 = vpop.permute.xlu1 %1596 }
 0x76b   : > { %v1620_v45 = vsel %vm1025_vm2, %v1597_v33, 0 }
 0x76e   : > { %v1601_v34 = vpop.permute.xlu1 %1600 }
 0x76f   : > { %v1626_v48 = vsel %vm1025_vm2, %v1601_v34, 0  ;;  %v2518_v34 = vld [vmem:[%s2802_s27] sm:$0xff]  ;;  %s1897_s27 = sshll.u32 %s2976_s20, 4  ;;  %s3172_s27 = int_to_ptr.vmem [resolvable:$true] %s1897_s27 }
 0x772   : > { %v1579_v35 = vpop.permute.xlu1 %1578 }
 0x774   : > { %1503 = vrot.lane.b32.xlu0 %v2948_v27, %s2603_s22  ;;  %s2606_s22 = smov 16  }
 0x776   : > { %v1694_v36 = vpop.permute.xlu1 %1693 }
 0x777   : > { %2393 = vmatpush3.bf16.msra.mxu1 %v1694_v36 }
 0x778   : > { %1590 = vrot.lane.b32.xlu0 %v2843_v7, %s2604_s17  ;;  %2394 = vmatprep.subr.bf16.mxu1 %v2599_v12 }
 0x77c   : > { %1594 = vrot.lane.b32.xlu0 %v2847_v14, %s2604_s17 }
 0x780   : > { %1598 = vrot.lane.b32.xlu0 %v2864_v23, %s2604_s17 }
 0x784   : > { %1602 = vrot.lane.b32.xlu0 %v2878_v28, %s2604_s17  ;;  %v1614_v28 = vsel %vm1025_vm2, %v1593_v32, 0 }
 0x7eb   : > { %v1475_v37 = vpop.xlane.xlu0 %1474 }
 0x7ec   : > { %2510 = vrcp.f32 %v1475_v37 }
 0x7ef   : > { %v1504_v38 = vpop.permute.xlu0 %1503 }
 0x7f0   : > { %2367 = vmatpush3.bf16.msra.mxu0 %v1504_v38 }
 0x7f1   : > { %2372 = vmatprep.subr.bf16.mxu0 %v2599_v12 }
 0x7f3   : > { %v1591_v14 = vpop.permute.xlu0 %1590 }
 0x7f4   : > { %v1611_v23 = vsel %vm1025_vm2, %v1591_v14, 0 }
 0x7f6   : > { %v2511_v39 = vpop.eup %2510 }
 0x7f7   : > { %v1477_v40 = vmul.f32 %v2511_v39, %v2509_v55  ;;  %v1595_v42 = vpop.permute.xlu0 %1594  ;;  %v2092_v55 = vld [vmem:[%s3251_s11] ss:$0 sm:$0xff] }
 0x7f8   : > { %v1617_v43 = vsel %vm1025_vm2, %v1595_v42, 0 }
 0x7f9   : > { %v1478_v7 = vpack.c.bf16 %v1477_v40, %v1477_v40 }
 0x7fb   : > { %2087 = vst [vmem:[%s2976_s20 + $0x8] sm:$0xf] %v1478_v7  ;;  %2369 = vmatmul.mubr.bf16.vlgmr.msra.gmra.mrb[24].mxu0 %v1478_v7  ;;  %v1599_v46 = vpop.permute.xlu0 %1598 }
 0x7fc   : > { %2373 = vmatpush3.bf16.xpose.msra.mxu0 %v1608_v41  ;;  %2388 = vmatprep.mubr.msk.bf16.mxu0 %vm2600_vm1, %v2599_v12  ;;  %v1623_v47 = vsel %vm1025_vm2, %v1599_v46, 0 }
 0x7fd   : > { %2374 = vmatprep.subr.bf16.mxu0 %v2599_v12 }
 0x7ff   : > { %v1603_v49 = vpop.permute.xlu0 %1602 }
 0x800   : > { %v1629_v50 = vsel %vm1025_vm2, %v1603_v49, 0 }
 0x804   : > { %2375 = vmatpush3.bf16.xpose.msra.mxu0 %v1611_v23 }
 0x805   : > { %2376 = vmatprep.subr.bf16.mxu0 %v2599_v12 }
 0x80c   : > { %2377 = vmatpush3.bf16.xpose.msra.mxu0 %v1614_v28 }
 0x80d   : > { %2378 = vmatprep.subr.bf16.mxu0 %v2599_v12 }
 0x814   : > { %2379 = vmatpush3.bf16.xpose.msra.mxu0 %v1617_v43 }
 0x815   : > { %2380 = vmatprep.subr.bf16.mxu0 %v2599_v12 }
 0x81c   : > { %2381 = vmatpush3.bf16.xpose.msra.mxu0 %v1620_v45 }
 0x81d   : > { %2382 = vmatprep.subr.bf16.mxu0 %v2599_v12 }
 0x824   : > { %2383 = vmatpush3.bf16.xpose.msra.mxu0 %v1623_v47 }
 0x825   : > { %2384 = vmatprep.subr.bf16.mxu0 %v2599_v12 }
 0x82c   : > { %2385 = vmatpush3.bf16.xpose.msra.mxu0 %v1626_v48 }
 0x82d   : > { %2386 = vmatprep.subr.bf16.mxu0 %v2599_v12 }
 0x834   : > { %2387 = vmatpush3.bf16.xpose.msra.mxu0 %v1629_v50 }
 0x83b   : > { %2389 = vmatmul.mubr.msk.bf16.vlgmr.msra.gmra.mrb[28].mxu0 %vm1025_vm2, %v1579_v35 }
 0x8ce   : > { %v1547_v51 = vpop.f32.mrb[24].mxu0 }
 0x8cf   : > { %v2370_v52 = vpop.f32.mrb[25].mxu0  ;;  %v2104_v10 = vpack.c.bf16 %v1547_v51, %v1547_v51 }
 0x8d0   : > { %v1550_v53 = vpop.f32.mrb[26].mxu0 }
 0x8d1   : > { %v2371_v54 = vpop.f32.mrb[27].mxu0 }
 0x90e   : > { %v1665_v56 = vpop.f32.mrb[28].mxu0 }
 0x90f   : > { %v1671_v58 = vmul.f32 0.35355338, %v1665_v56  ;;  %v2390_v59 = vpop.f32.mrb[29].mxu0 }
 0x910   : > { %v1668_v60 = vpop.f32.mrb[30].mxu0 }
 0x911   : > { %v2391_v61 = vpop.f32.mrb[31].mxu0  ;;  %v1672_v62 = vsel %vm2964_vm4, -1e+30, %v1671_v58 }
 0x912   : > { %1673 = vmax.xlane.f32.xlu0 %v1672_v62 }
 0x928   : > { %1695 = vrot.lane.b32.xlu0 %v2916_v57, %s2604_s17  ;;  %v1698_v57 = vpop.permute.xlu1 %1697 }
 0x92c   : > { %1699 = vrot.lane.b32.xlu0 %v2922_v4, %s2604_s17  ;;  %v1704_v8 = vpop.permute.xlu1 %1703 }
 0x930   : > { %1701 = vrot.lane.b32.xlu0 %v2935_v19, %s2604_s17 }
 0x934   : > { %1705 = vrot.lane.b32.xlu0 %v2944_v26, %s2604_s17 }
 0x938   : > { %1353 = vrot.lane.b32.xlu0 %v2103_v63, %s2605_s24 }
 0x99f   : > { %v1674_v44 = vpop.xlane.xlu0 %1673 }
 0x9a0   : > { %v1675_v1 = vsub.f32 %v1672_v62, %v1674_v44 }
 0x9a2   : > { %v1676_v2 = vmul.f32 1.442695, %v1675_v1 }
 0x9a3   : > { %v1696_v3 = vpop.permute.xlu0 %1695 }
 0x9a4   : > { %2512 = vpow2.f32 %v1676_v2  ;;  %2395 = vmatpush3.bf16.msra.mxu1 %v1696_v3 }
 0x9a5   : > { %2396 = vmatprep.subr.bf16.mxu1 %v2599_v12 }
 0x9a7   : > { %v1700_v4 = vpop.permute.xlu0 %1699 }
 0x9a8   : > { %2397 = vmatpush3.bf16.msra.mxu1 %v1698_v57 }
 0x9a9   : > { %2398 = vmatprep.subr.bf16.mxu1 %v2599_v12 }
 0x9ab   : > { %v1702_v19 = vpop.permute.xlu0 %1701 }
 0x9ac   : > { %2399 = vmatpush3.bf16.msra.mxu1 %v1700_v4 }
 0x9ad   : > { %2400 = vmatprep.subr.bf16.mxu1 %v2599_v12 }
 0x9ae   : > { %v2513_v26 = vpop.eup %2512 }
 0x9af   : > { %1678 = vadd.xlane.f32.xlu1 %v2513_v26  ;;  %v1706_v6 = vpop.permute.xlu0 %1705 }
 0x9b0   : > { %2401 = vmatpush3.bf16.msra.mxu1 %v1702_v19 }
 0x9b1   : > { %2402 = vmatprep.subr.bf16.mxu1 %v2599_v12 }
 0x9b3   : > { %v1354_v9 = vpop.permute.xlu0 %1353 }
 0x9b4   : > { %1357 = vst.msk [vmem:[#allocation4] sm:$0xf] %vm1356_vm6, %v1354_v9  ;;  %2403 = vmatpush3.bf16.msra.mxu1 %v1704_v8 }
 0x9b5   : > { %2404 = vmatprep.subr.bf16.mxu1 %v2599_v12 }
 0x9b8   : > { %2405 = vmatpush3.bf16.msra.mxu1 %v1706_v6 }
 0x9b9   : > { %2406 = vmatprep.subr.bf16.mxu1 %v2599_v12 }
 0x9c0   : > { %1707 = vrot.lane.b32.xlu1 %v2948_v27, %s2604_s17  ;;  %v2498_v27 = vld [vmem:[%s3250_s10] sm:$0xff]   ;;  %s2099_s17 = sshll.u32 %s2589_s21, 6 }
 0x9c1   : > { %s3178_s1 = scalar_lea.hbm %s3255_s15, %s2099_s17 }
 0x9c4   : > { %1557 = vrot.lane.b32.xlu1 %v2104_v10, %s2606_s22  ;;  %s602_s22 = scalar_lea.vmem %s3243_s3, %s2053_s25  ;;  %s2608_s25 = smov [#allocation5]  }
 0x9c5   : > { %v1864_v41 = vld [vmem:[%s602_s22] sm:$0xf] }
 0x9c6   : > { %v1865_v14 = vunpack.c.l.bf16 %v1864_v41 }
 0xa3c   : > { %v1679_v11 = vpop.xlane.xlu1 %1678 }
 0xa3d   : > { %2514 = vrcp.f32 %v1679_v11 }
 0xa40   : > { %v1708_v13 = vpop.permute.xlu1 %1707 }
 0xa41   : > { %2407 = vmatpush3.bf16.msra.mxu1 %v1708_v13 }
 0xa42   : > { %2412 = vmatprep.subr.bf16.mxu1 %v2599_v12 }
 0xa44   : > { %v1558_v15 = vpop.permute.xlu1 %1557 }
 0xa45   : > { %1561 = vst.msk [vmem:[#allocation4] sm:$0xf] %vm1560_vm7, %v1558_v15 }
 0xa47   : > { %v2515_v16 = vpop.eup %2514 }
 0xa48   : > { %v1681_v17 = vmul.f32 %v2515_v16, %v2513_v26 }
 0xa4a   : > { %v1682_v18 = vpack.c.bf16 %v1681_v17, %v1681_v17 }
 0xa4c   : > { %2090 = vst [vmem:[%s2976_s20 + $0xc] sm:$0xf] %v1682_v18  ;;  %2409 = vmatmul.mubr.bf16.vlgmr.msra.gmra.mrb[32].mxu1 %v1682_v18  ;;  %s2523_s20 = sshll.u32 %s2608_s25, 4  ;;  %s2524_s20 = int_to_ptr.vmem [resolvable:$false] %s2523_s20 }
 0xa4d   : > { %2416 = vmatprep.mubr.msk.bf16.mxu1 %vm2600_vm1, %v2599_v12  ;;  %2413 = vmatpush3.bf16.msra.mxu1 %v2498_v27  ;;  %s2525_s24 = scalar_lea.vmem %s2524_s20, 512  ;;  %p2526_p1 = scmp.lt.s32.totalorder %s3172_s27, %s2524_s20 }
 0xa4e   : > { %2414 = vmatprep.subr.bf16.mxu1 %v2599_v12 }
 0xa51   : > { %2415 = vmatpush3.bf16.msra.mxu1 %v2499_v25 }
 0xb1f   : > { %v1751_v0 = vpop.f32.mrb[32].mxu1 }
 0xb20   : > { %v2105_v20 = vpack.c.bf16 %v1751_v0, %v1751_v0  ;;  %v2410_v30 = vpop.f32.mrb[33].mxu1 }
 0xb21   : > { %v1754_v31 = vpop.f32.mrb[34].mxu1 }
 0xb22   : > { %1761 = vrot.lane.b32.xlu0 %v2105_v20, %s2607_s16  ;;  %v2411_v21 = vpop.f32.mrb[35].mxu1  ;;  %s2519_s16 = scalar_lea.vmem %s3172_s27, 256 }
 0xb23   : > { %p2520_p12 = scmp.ne.s32.totalorder %s3172_s27, %s2519_s16  ;;  %p2527_p2 = scmp.lt.s32.totalorder %s2525_s24, %s2519_s16 }
 0xb25   : > { %p2521_p13 = pnand %p2520_p12, %p2732_p4  ;;  %p2528_p3 = por %p2527_p2, %p2526_p1 }
 0xb27   : > { %p2522_p0 = pneg %p2521_p13 }
 0xb29   : > { %p2529_p5 = pnand %p2528_p3, %p2522_p0 }
 0xb94   : > { %v1762_v24 = vpop.permute.xlu0 %1761 }
 0xb95   : > { %1765 = vst.msk [vmem:[#allocation4] sm:$0xf] %vm1764_vm8, %v1762_v24 }
 0xb9c   : > { %v1766_v29 = vld [vmem:[#allocation4] sm:$0xf] }
 0xb9d   : > { %2417 = vmatmul.mubr.msk.bf16.vlgmr.msra.gmra.mrb[36].mxu1 %vm664_vm0, %v1766_v29 }
 0xc70   : > { %v1827_v12 = vpop.f32.mrb[36].mxu1 }
 0xc71   : > { %v1828_v5 = vadd.f32 %v2092_v55, %v1827_v12  ;;  %v2418_v22 = vpop.f32.mrb[37].mxu1 }
 0xc72   : > { %v1830_v32 = vpop.f32.mrb[38].mxu1 }
 0xc73   : > { %v2419_v33 = vpop.f32.mrb[39].mxu1  ;;  %v1833_v35 = vadd.f32 %v2518_v34, %v1828_v5 }
 0xc75   : > { %v1836_v36 = vsel %vm664_vm0, %v1833_v35, 0.0 }
 0xc76   : > { %1837 = vadd.xlane.f32.xlu1 %v1836_v36 }
 0xd03   : > { %v1838_v37 = vpop.xlane.xlu1 %1837 }
 0xd04   : > { %v1840_v38 = vmul.f32 0.03125, %v1838_v37 }
 0xd06   : > { %v1841_v39 = vsub.f32 %v1833_v35, %v1840_v38 }
 0xd08   : > { %v1842_v40 = vmul.f32 %v1841_v39, %v1841_v39 }
 0xd0a   : > { %v1843_v7 = vsel %vm664_vm0, %v1842_v40, 0.0 }
 0xd0b   : > { %1844 = vadd.xlane.f32.xlu0 %v1843_v7 }
 0xd21   : > { %1868 = vperm.xlu0 %2491, %v1865_v14  }
 0xd22   : > { %2532 = shalt.err (!%p2529_p5)
}
 0xd23   : > { %s2533_s0 = scalar_lea.hbm %s3178_s1, 256  ;;  %s2537_s22 = scalar_lea.hbm %s3255_s15, 512 }
 0xd24   : > { %p2534_p6 = scmp.ne.s32.totalorder %s3178_s1, %s2533_s0  ;;  %p2538_p10 = scmp.lt.u32.totalorder %s3178_s1, %s3255_s15 }
 0xd25   : > { %p2539_p11 = scmp.lt.u32.totalorder %s2537_s22, %s2533_s0  ;;  %p2541_p13 = scmp.lt.u32.totalorder %s2533_s0, %s3178_s1 }
 0xd26   : > { %p2535_p7 = pnand %p2534_p6, %p2732_p4 }
 0xd27   : > { %p2540_p12 = por %p2539_p11, %p2538_p10 }
 0xd28   : > { %p2536_p9 = pneg %p2535_p7 }
 0xd29   : > { %p2542_p0 = por %p2541_p13, %p2540_p12 }
 0xd2b   : > { %p2543_p1 = pnand %p2542_p0, %p2536_p9 }
 0xd2d   : > { %2546 = shalt.err (!%p2543_p1)
}
 0xd2e   : > { %s2609_s16 = smov 64   ;;  %s2610_s25 = smov 128   ;;  %v2096_v45 = vld [vmem:[%s3252_s12] ss:$0 sm:$0xff] }
 0xd2f   : > { %s2611_s20 = smov 4   ;;  %v2097_v47 = vld [vmem:[%s3253_s13] ss:$0 sm:$0xff]  ;;  %s3278_s22 = sshll.u32 %s2755_s29, 3 }
 0xd30   : > { %2424 = dma.vmem_to_hbm [thread:$0]  (%p2732_p4), %s3172_s27, 256, %s3178_s1, %s3182_s4, %s2609_s16, %s2610_s25, %s2611_s20  }
 0xd31   : > { %s609_s4 = scalar_lea.vmem %s3254_s14, %s3278_s22 }
 0xd98   : > { %v1845_v23 = vpop.xlane.xlu0 %1844 }
 0xd99   : > { %v1846_v28 = vmul.f32 0.03125, %v1845_v23 }
 0xd9b   : > { %v1847_v42 = vadd.f32 1e-05, %v1846_v28 }
 0xd9d   : > { %2516 = vrsqrt.f32 %v1847_v42 }
 0xda0   : > { %v1869_v49 = vpop.permute.xlu0 %1868 }
 0xda7   : > { %v2517_v43 = vpop.eup %2516 }
 0xda8   : > { %v1849_v46 = vmul.f32 %v2517_v43, %v1841_v39 }
 0xdaa   : > { %v1856_v48 = vmul.f32 %v2096_v45, %v1849_v46 }
 0xdac   : > { %v1863_v50 = vadd.f32 %v2097_v47, %v1856_v48 }
 0xdae   : > { %v1871_v51 = vmul.f32 %v1869_v49, %v1863_v50 }
 0xdb0   : > { %1872 = vst.msk [vmem:[%s609_s4] sm:$0xff] %vm664_vm0, %v1871_v51 }
 0xdb1 PF: > { %p2430_p4 = scmp.ge.s32.totalorder %s2597_s23, 2  ;;  %s1922_s27 = sand.u32 1, %s2577_s18  }
 0xdb2   : > { %s1923_s17 = scalar_lea.sflag [#allocation6], %s1922_s27 }
 0xdb3   : > { %p2427_p2 = pnand %p2430_p4, %p2739_p8 }
 0xdb5   : > { %2572 = dma.done.wait (!%p2427_p2), %s1923_s17, 256  }
 0xdb6   : > { %2574 = vsyncadd (!%p2427_p2), %s1923_s17, 4294967040  ;;  %s29_s23 = sadd.s32 1, %s2597_s23   ;;  %s3279_s29 = sld [smem:[#allocation8_spill]] }
 0xdb7   : > { %p26_p3 = scmp.ge.s32.totalorder %s29_s23, 4   ;;  %s3280_s20 = sld [smem:[#allocation11_spill]] }
 0xdb8   : > { %s3281_s21 = sld [smem:[#allocation9_spill]]  ;;  %s3282_s22 = sld [smem:[#allocation10_spill]] }
 0xdb9   : > { %s3283_s18 = smov %s2581_s19  ;;  %28 = sbr.rel (!%p26_p3) target bundleno = 9 (0x9), region = 139 }
 0xdbc   : > { %s3284_s19 = smov %s3279_s29 }
 0xdc0   :  { %1928 = vsyncpa [#allocation6], 1 }
 0xdc1   :  { %1930 = vsyncpa [#allocation6 + $0x1], 1 }

</bundles_post_ra>
